<compile_context>
chip_gen: v7x
topology: tpu7x:2x2x1
jax: 0.10.0
libtpu: 0.0.40
codegen_flags: <defaults>
</compile_context>

<pallas_src>
import functools

import jax
import jax.numpy as jnp
from jax.experimental import pallas as pl
from jax.experimental.pallas import tpu as pltpu


_LANE = 128   # pad conv1's folded K (9*S_in) up to a lane-dense multiple of this
_OFF = 8      # aligned column offset of the conv2 interior inside the halo'd scratch


def _round_up(x, m):
    return (x + m - 1) // m * m


# ------------------------------ Pallas kernel ------------------------------ #

def _fused_predictor_kernel(xcol_ref, w1_ref, b1_ref, w2_ref, b2_ref, o_ref,
                            hpad_ref, *, H, W, HID, S_OUT, WPAD):
    """Fused conv3x3+LeakyReLU -> conv3x3+LeakyReLU for ONE batch element.

    xcol_ref : (H*W, K1P)        bf16 im2col slab for conv1 (9 taps folded into K)
    w1_ref   : (K1P, HID)        bf16 conv1 weights (tap-major K, zero-padded rows)
    b1_ref   : (1, HID)          f32
    w2_ref   : (9, HID, S_OUT)   bf16 conv2 weights, tap-major
    b2_ref   : (1, S_OUT)        f32
    o_ref    : (H*W, S_OUT)      f32 output (compact: real channels only)
    hpad_ref : (H+2, WPAD, HID)  f32 scratch: zero-halo'd hidden activation
    """
    f32 = jnp.float32

    # ------------- conv1: ONE fused-K MXU dot + bias + LeakyReLU ------------- #
    h1 = jnp.dot(xcol_ref[...], w1_ref[...], preferred_element_type=f32)  # (H*W, HID)
    h1 = h1 + b1_ref[...]
    hidden = jnp.where(h1 >= 0.0, h1, 0.2 * h1)                           # f32

    # ------- stage hidden into its halo'd scratch (halo-only clearing) ------- #
    # Only the cells actually read as padding need to be zero: columns _OFF-1 and
    # _OFF+W (covered by the two aligned 8-wide bands) and rows 0 / H+1.
    hpad_ref[:, 0:_OFF, :] = jnp.zeros((H + 2, _OFF, HID), f32)
    hpad_ref[:, _OFF + W:WPAD, :] = jnp.zeros((H + 2, WPAD - _OFF - W, HID), f32)
    hpad_ref[0, _OFF:_OFF + W, :] = jnp.zeros((W, HID), f32)
    hpad_ref[H + 1, _OFF:_OFF + W, :] = jnp.zeros((W, HID), f32)
    # Interior: one slab store (no per-row loop).
    hpad_ref[1:H + 1, _OFF:_OFF + W, :] = hidden.reshape(H, W, HID)

    # -------- conv2: 9 tap dots, LHS read straight from the scratch ---------- #
    # No staging buffers / stores; K is the real hidden width (no zero padding).
    acc = jnp.zeros((H * W, S_OUT), f32)
    for dy in range(3):
        for dx in range(3):
            col0 = _OFF - 1 + dx
            lhs = hpad_ref[dy:dy + H, col0:col0 + W, :].reshape(H * W, HID)
            acc = acc + jnp.dot(lhs.astype(jnp.bfloat16), w2_ref[dy * 3 + dx],
                                preferred_element_type=f32)
    acc = acc + b2_ref[...]
    o_ref[...] = jnp.where(acc >= 0.0, acc, 0.2 * acc).astype(o_ref.dtype)


# ------------------------------ Predictor fwd ------------------------------ #

@jax.jit
def predictor_forward(x_sb1hw, w1, b1, w2, b2):
    """x: (S_in, B, 1, H, W) -> (S_out, B, 1, H, W)."""
    S_in, B, _, H, W = x_sb1hw.shape
    Hid, wc_in, KH, KW = w1.shape
    S_out = w2.shape[0]
    assert (KH, KW) == (3, 3), "kernel expects 3x3 convolutions"
    assert wc_in == S_in and w2.shape[1] == Hid
    assert W % 8 == 0, "W must be a multiple of 8"

    K1 = 9 * S_in
    K1P = _round_up(K1, _LANE)              # lane-dense folded K for conv1
    WPAD = _round_up(_OFF + W + 1, 8)       # halo'd scratch width (aligned interior)

    # ---- entry permute + conv1 im2col (layout plumbing, done once by XLA) ----
    x_bhwc = jnp.transpose(x_sb1hw[:, :, 0], (1, 2, 3, 0))              # (B,H,W,S_in)
    x_pad = jnp.pad(x_bhwc, ((0, 0), (1, 1), (1, 1), (0, 0)))
    taps = [x_pad[:, dy:dy + H, dx:dx + W, :] for dy in range(3) for dx in range(3)]
    x_col = jnp.stack(taps, axis=3).reshape(B, H * W, K1)               # k = tap*S_in + c
    x_col = jnp.pad(x_col, ((0, 0), (0, 0), (0, K1P - K1))).astype(jnp.bfloat16)

    # ---- weights: OIHW -> tap-major matmul layouts, bf16 for the MXU ----
    w1_m = jnp.transpose(w1, (2, 3, 1, 0)).reshape(K1, Hid)             # (9*S_in, Hid)
    w1_m = jnp.pad(w1_m, ((0, K1P - K1), (0, 0))).astype(jnp.bfloat16)  # (K1P, Hid)
    b1_m = b1.reshape(1, Hid).astype(jnp.float32)
    w2_m = jnp.transpose(w2, (2, 3, 1, 0)).reshape(9, Hid, S_out).astype(jnp.bfloat16)
    b2_m = b2.reshape(1, S_out).astype(jnp.float32)

    kernel = functools.partial(_fused_predictor_kernel,
                               H=H, W=W, HID=Hid, S_OUT=S_out, WPAD=WPAD)

    out = pl.pallas_call(
        kernel,
        out_shape=jax.ShapeDtypeStruct((B, H * W, S_out), jnp.float32),
        grid=(B,),
        in_specs=[
            pl.BlockSpec((None, H * W, K1P), lambda b: (b, 0, 0)),   # im2col slab
            pl.BlockSpec((K1P, Hid), lambda b: (0, 0)),              # w1 (resident)
            pl.BlockSpec((1, Hid), lambda b: (0, 0)),                # b1
            pl.BlockSpec((9, Hid, S_out), lambda b: (0, 0, 0)),      # w2 (resident)
            pl.BlockSpec((1, S_out), lambda b: (0, 0)),              # b2
        ],
        out_specs=pl.BlockSpec((None, H * W, S_out), lambda b: (b, 0, 0)),
        scratch_shapes=[
            pltpu.VMEM((H + 2, WPAD, Hid), jnp.float32),             # halo'd hidden
        ],
        compiler_params=pltpu.CompilerParams(
            dimension_semantics=("parallel",)),
    )(x_col, w1_m, b1_m, w2_m, b2_m)

    # ---- exit: compact output back to (S_out, B, 1, H, W) ----
    y = out.reshape(B, H, W, S_out)
    return jnp.transpose(y, (3, 0, 1, 2))[:, :, None]


# ---------------------------- pure-JAX reference ---------------------------- #

def _conv_ref(x_nchw, w, b):
    y = jax.lax.conv_general_dilated(
        x_nchw, w, window_strides=(1, 1), padding=((1, 1), (1, 1)),
        dimension_numbers=("NCHW", "OIHW", "NCHW"))
    y = y + b[None, :, None, None]
    return jnp.where(y >= 0.0, y, 0.2 * y)


def _predictor_ref(x_sb1hw, w1, b1, w2, b2):
    x_bshw = jnp.transpose(x_sb1hw[:, :, 0], (1, 0, 2, 3))
    y = _conv_ref(_conv_ref(x_bshw, w1, b1), w2, b2)
    return jnp.transpose(y[:, :, None], (1, 0, 2, 3, 4))


# ----------------------------------- main ----------------------------------- #

if __name__ == "__main__":
    S_IN, S_OUT, HIDDEN = 8, 8, 32
    B, H, W = 2, 16, 16

    key = jax.random.PRNGKey(0)
    k_x, k_w1, k_b1, k_w2, k_b2 = jax.random.split(key, 5)

    # Deterministic synthetic parameters (PyTorch Conv2d weight layout: OIHW).
    x = jax.random.normal(k_x, (S_IN, B, 1, H, W), dtype=jnp.float32)
    w1 = jax.random.normal(k_w1, (HIDDEN, S_IN, 3, 3), dtype=jnp.float32) * 0.1
    b1 = jax.random.normal(k_b1, (HIDDEN,), dtype=jnp.float32) * 0.1
    w2 = jax.random.normal(k_w2, (S_OUT, HIDDEN, 3, 3), dtype=jnp.float32) * 0.1
    b2 = jax.random.normal(k_b2, (S_OUT,), dtype=jnp.float32) * 0.1

    out = jax.block_until_ready(predictor_forward(x, w1, b1, w2, b2))
    assert out.shape == (S_OUT, B, 1, H, W), out.shape

    ref = _predictor_ref(x, w1, b1, w2, b2)
    max_err = float(jnp.max(jnp.abs(out - ref)))
    # bf16 MXU operands with f32 accumulation -> loosened tolerance (review note).
    assert jnp.allclose(out, ref, atol=5e-2, rtol=5e-2), max_err

    print("KERNEL_OK")
</pallas_src>

<mosaic_0001>
module attributes {stable_mosaic.version = 11 : i64} {
  func.func @_fused_predictor_kernel(%arg0: i32, %arg1: memref<1x256x128xbf16, #tpu.memory_space<vmem>>, %arg2: memref<128x32xbf16, #tpu.memory_space<vmem>>, %arg3: memref<1x32xf32, #tpu.memory_space<vmem>>, %arg4: memref<9x32x8xbf16, #tpu.memory_space<vmem>>, %arg5: memref<1x8xf32, #tpu.memory_space<vmem>>, %arg6: memref<1x256x8xf32, #tpu.memory_space<vmem>>, %arg7: memref<18x32x32xf32, #tpu.memory_space<vmem>>) attributes {dimension_semantics = [#tpu.dimension_semantics<parallel>], iteration_bounds = array<i64: 2>, scalar_prefetch = 0 : i64, scratch_operands = 1 : i64, tpu.core_type = #tpu.core_type<tc>, window_params = [{transform_indices = @transform_0, window_bounds = array<i64: 1, 256, 128>}, {pipeline_mode = #tpu.pipeline_mode<synchronous>, transform_indices = @transform_1, window_bounds = array<i64: 128, 32>}, {pipeline_mode = #tpu.pipeline_mode<synchronous>, transform_indices = @transform_2, window_bounds = array<i64: 1, 32>}, {pipeline_mode = #tpu.pipeline_mode<synchronous>, transform_indices = @transform_3, window_bounds = array<i64: 9, 32, 8>}, {pipeline_mode = #tpu.pipeline_mode<synchronous>, transform_indices = @transform_4, window_bounds = array<i64: 1, 8>}, {transform_indices = @transform_5, window_bounds = array<i64: 1, 256, 8>}]} {
    %c0 = arith.constant 0 : index
    %c0_0 = arith.constant 0 : index
    %c0_1 = arith.constant 0 : index
    %0 = vector.load %arg1[%c0, %c0_0, %c0_1] : memref<1x256x128xbf16, #tpu.memory_space<vmem>>, vector<1x256x128xbf16>
    %1 = vector.shape_cast %0 : vector<1x256x128xbf16> to vector<256x128xbf16>
    %c0_2 = arith.constant 0 : index
    %c0_3 = arith.constant 0 : index
    %2 = vector.load %arg2[%c0_2, %c0_3] : memref<128x32xbf16, #tpu.memory_space<vmem>>, vector<128x32xbf16>
    %cst = arith.constant dense<0.000000e+00> : vector<256x32xf32>
    %3 = tpu.matmul %1, %2, %cst {dimension_numbers = #tpu.dot_dimension_numbers<[1], [0], [0], [1], [0, 0, 1, 1], [], []>} : vector<256x128xbf16>, vector<128x32xbf16>, vector<256x32xf32> -> vector<256x32xf32>
    %c0_4 = arith.constant 0 : index
    %c0_5 = arith.constant 0 : index
    %4 = vector.load %arg3[%c0_4, %c0_5] : memref<1x32xf32, #tpu.memory_space<vmem>>, vector<1x32xf32>
    %5 = vector.broadcast %4 : vector<1x32xf32> to vector<256x32xf32>
    %6 = arith.addf %3, %5 : vector<256x32xf32>
    %cst_6 = arith.constant 0.000000e+00 : f32
    %7 = vector.broadcast %cst_6 : f32 to vector<256x32xf32>
    %8 = arith.cmpf oge, %6, %7 : vector<256x32xf32>
    %cst_7 = arith.constant 2.000000e-01 : f32
    %9 = vector.broadcast %cst_7 : f32 to vector<256x32xf32>
    %10 = arith.mulf %9, %6 : vector<256x32xf32>
    %11 = arith.select %8, %6, %10 : vector<256x32xi1>, vector<256x32xf32>
    %cst_8 = arith.constant 0.000000e+00 : f32
    %12 = vector.broadcast %cst_8 : f32 to vector<18x8x32xf32>
    %c0_9 = arith.constant 0 : index
    %c0_10 = arith.constant 0 : index
    %c0_11 = arith.constant 0 : index
    %13 = vector.load %arg7[%c0_9, %c0_10, %c0_11] : memref<18x32x32xf32, #tpu.memory_space<vmem>>, vector<18x8x32xf32>
    tpu.vector_store %arg7[%c0_9, %c0_10, %c0_11], %12 {strides = array<i32>} : memref<18x32x32xf32, #tpu.memory_space<vmem>>, vector<18x8x32xf32>,
    %cst_12 = arith.constant 0.000000e+00 : f32
    %14 = vector.broadcast %cst_12 : f32 to vector<18x8x32xf32>
    %c0_13 = arith.constant 0 : index
    %c24 = arith.constant 24 : index
    %c0_14 = arith.constant 0 : index
    %15 = vector.load %arg7[%c0_13, %c24, %c0_14] : memref<18x32x32xf32, #tpu.memory_space<vmem>>, vector<18x8x32xf32>
    tpu.vector_store %arg7[%c0_13, %c24, %c0_14], %14 {strides = array<i32>} : memref<18x32x32xf32, #tpu.memory_space<vmem>>, vector<18x8x32xf32>,
    %cst_15 = arith.constant 0.000000e+00 : f32
    %16 = vector.broadcast %cst_15 : f32 to vector<16x32xf32>
    %c0_16 = arith.constant 0 : index
    %c8 = arith.constant 8 : index
    %c0_17 = arith.constant 0 : index
    %17 = vector.load %arg7[%c0_16, %c8, %c0_17] : memref<18x32x32xf32, #tpu.memory_space<vmem>>, vector<1x16x32xf32>
    %18 = vector.shape_cast %17 : vector<1x16x32xf32> to vector<16x32xf32>
    %19 = vector.shape_cast %16 : vector<16x32xf32> to vector<1x16x32xf32>
    tpu.vector_store %arg7[%c0_16, %c8, %c0_17], %19 {strides = array<i32>} : memref<18x32x32xf32, #tpu.memory_space<vmem>>, vector<1x16x32xf32>,
    %cst_18 = arith.constant 0.000000e+00 : f32
    %20 = vector.broadcast %cst_18 : f32 to vector<16x32xf32>
    %c17 = arith.constant 17 : index
    %c8_19 = arith.constant 8 : index
    %c0_20 = arith.constant 0 : index
    %21 = vector.load %arg7[%c17, %c8_19, %c0_20] : memref<18x32x32xf32, #tpu.memory_space<vmem>>, vector<1x16x32xf32>
    %22 = vector.shape_cast %21 : vector<1x16x32xf32> to vector<16x32xf32>
    %23 = vector.shape_cast %20 : vector<16x32xf32> to vector<1x16x32xf32>
    tpu.vector_store %arg7[%c17, %c8_19, %c0_20], %23 {strides = array<i32>} : memref<18x32x32xf32, #tpu.memory_space<vmem>>, vector<1x16x32xf32>,
    %24 = vector.shape_cast %11 : vector<256x32xf32> to vector<16x16x32xf32>
    %c1 = arith.constant 1 : index
    %c8_21 = arith.constant 8 : index
    %c0_22 = arith.constant 0 : index
    %25 = vector.load %arg7[%c1, %c8_21, %c0_22] : memref<18x32x32xf32, #tpu.memory_space<vmem>>, vector<16x16x32xf32>
    tpu.vector_store %arg7[%c1, %c8_21, %c0_22], %24 {strides = array<i32>} : memref<18x32x32xf32, #tpu.memory_space<vmem>>, vector<16x16x32xf32>,
    %cst_23 = arith.constant 0.000000e+00 : f32
    %26 = vector.broadcast %cst_23 : f32 to vector<256x8xf32>
    %c0_24 = arith.constant 0 : index
    %c7 = arith.constant 7 : index
    %c0_25 = arith.constant 0 : index
    %27 = vector.load %arg7[%c0_24, %c7, %c0_25] : memref<18x32x32xf32, #tpu.memory_space<vmem>>, vector<16x16x32xf32>
    %28 = vector.shape_cast %27 : vector<16x16x32xf32> to vector<256x32xf32>
    %29 = arith.truncf %28 : vector<256x32xf32> to vector<256x32xbf16>
    %c0_26 = arith.constant 0 : index
    %c0_27 = arith.constant 0 : index
    %c0_28 = arith.constant 0 : index
    %30 = vector.load %arg4[%c0_26, %c0_27, %c0_28] : memref<9x32x8xbf16, #tpu.memory_space<vmem>>, vector<1x32x8xbf16>
    %31 = vector.shape_cast %30 : vector<1x32x8xbf16> to vector<32x8xbf16>
    %cst_29 = arith.constant dense<0.000000e+00> : vector<256x8xf32>
    %32 = tpu.matmul %29, %31, %cst_29 {dimension_numbers = #tpu.dot_dimension_numbers<[1], [0], [0], [1], [0, 0, 1, 1], [], []>} : vector<256x32xbf16>, vector<32x8xbf16>, vector<256x8xf32> -> vector<256x8xf32>
    %33 = arith.addf %26, %32 : vector<256x8xf32>
    %c0_30 = arith.constant 0 : index
    %c8_31 = arith.constant 8 : index
    %c0_32 = arith.constant 0 : index
    %34 = vector.load %arg7[%c0_30, %c8_31, %c0_32] : memref<18x32x32xf32, #tpu.memory_space<vmem>>, vector<16x16x32xf32>
    %35 = vector.shape_cast %34 : vector<16x16x32xf32> to vector<256x32xf32>
    %36 = arith.truncf %35 : vector<256x32xf32> to vector<256x32xbf16>
    %c1_33 = arith.constant 1 : index
    %c0_34 = arith.constant 0 : index
    %c0_35 = arith.constant 0 : index
    %37 = vector.load %arg4[%c1_33, %c0_34, %c0_35] : memref<9x32x8xbf16, #tpu.memory_space<vmem>>, vector<1x32x8xbf16>
    %38 = vector.shape_cast %37 : vector<1x32x8xbf16> to vector<32x8xbf16>
    %cst_36 = arith.constant dense<0.000000e+00> : vector<256x8xf32>
    %39 = tpu.matmul %36, %38, %cst_36 {dimension_numbers = #tpu.dot_dimension_numbers<[1], [0], [0], [1], [0, 0, 1, 1], [], []>} : vector<256x32xbf16>, vector<32x8xbf16>, vector<256x8xf32> -> vector<256x8xf32>
    %40 = arith.addf %33, %39 : vector<256x8xf32>
    %c0_37 = arith.constant 0 : index
    %c9 = arith.constant 9 : index
    %c0_38 = arith.constant 0 : index
    %41 = vector.load %arg7[%c0_37, %c9, %c0_38] : memref<18x32x32xf32, #tpu.memory_space<vmem>>, vector<16x16x32xf32>
    %42 = vector.shape_cast %41 : vector<16x16x32xf32> to vector<256x32xf32>
    %43 = arith.truncf %42 : vector<256x32xf32> to vector<256x32xbf16>
    %c2 = arith.constant 2 : index
    %c0_39 = arith.constant 0 : index
    %c0_40 = arith.constant 0 : index
    %44 = vector.load %arg4[%c2, %c0_39, %c0_40] : memref<9x32x8xbf16, #tpu.memory_space<vmem>>, vector<1x32x8xbf16>
    %45 = vector.shape_cast %44 : vector<1x32x8xbf16> to vector<32x8xbf16>
    %cst_41 = arith.constant dense<0.000000e+00> : vector<256x8xf32>
    %46 = tpu.matmul %43, %45, %cst_41 {dimension_numbers = #tpu.dot_dimension_numbers<[1], [0], [0], [1], [0, 0, 1, 1], [], []>} : vector<256x32xbf16>, vector<32x8xbf16>, vector<256x8xf32> -> vector<256x8xf32>
    %47 = arith.addf %40, %46 : vector<256x8xf32>
    %c1_42 = arith.constant 1 : index
    %c7_43 = arith.constant 7 : index
    %c0_44 = arith.constant 0 : index
    %48 = vector.load %arg7[%c1_42, %c7_43, %c0_44] : memref<18x32x32xf32, #tpu.memory_space<vmem>>, vector<16x16x32xf32>
    %49 = vector.shape_cast %48 : vector<16x16x32xf32> to vector<256x32xf32>
    %50 = arith.truncf %49 : vector<256x32xf32> to vector<256x32xbf16>
    %c3 = arith.constant 3 : index
    %c0_45 = arith.constant 0 : index
    %c0_46 = arith.constant 0 : index
    %51 = vector.load %arg4[%c3, %c0_45, %c0_46] : memref<9x32x8xbf16, #tpu.memory_space<vmem>>, vector<1x32x8xbf16>
    %52 = vector.shape_cast %51 : vector<1x32x8xbf16> to vector<32x8xbf16>
    %cst_47 = arith.constant dense<0.000000e+00> : vector<256x8xf32>
    %53 = tpu.matmul %50, %52, %cst_47 {dimension_numbers = #tpu.dot_dimension_numbers<[1], [0], [0], [1], [0, 0, 1, 1], [], []>} : vector<256x32xbf16>, vector<32x8xbf16>, vector<256x8xf32> -> vector<256x8xf32>
    %54 = arith.addf %47, %53 : vector<256x8xf32>
    %c1_48 = arith.constant 1 : index
    %c8_49 = arith.constant 8 : index
    %c0_50 = arith.constant 0 : index
    %55 = vector.load %arg7[%c1_48, %c8_49, %c0_50] : memref<18x32x32xf32, #tpu.memory_space<vmem>>, vector<16x16x32xf32>
    %56 = vector.shape_cast %55 : vector<16x16x32xf32> to vector<256x32xf32>
    %57 = arith.truncf %56 : vector<256x32xf32> to vector<256x32xbf16>
    %c4 = arith.constant 4 : index
    %c0_51 = arith.constant 0 : index
    %c0_52 = arith.constant 0 : index
    %58 = vector.load %arg4[%c4, %c0_51, %c0_52] : memref<9x32x8xbf16, #tpu.memory_space<vmem>>, vector<1x32x8xbf16>
    %59 = vector.shape_cast %58 : vector<1x32x8xbf16> to vector<32x8xbf16>
    %cst_53 = arith.constant dense<0.000000e+00> : vector<256x8xf32>
    %60 = tpu.matmul %57, %59, %cst_53 {dimension_numbers = #tpu.dot_dimension_numbers<[1], [0], [0], [1], [0, 0, 1, 1], [], []>} : vector<256x32xbf16>, vector<32x8xbf16>, vector<256x8xf32> -> vector<256x8xf32>
    %61 = arith.addf %54, %60 : vector<256x8xf32>
    %c1_54 = arith.constant 1 : index
    %c9_55 = arith.constant 9 : index
    %c0_56 = arith.constant 0 : index
    %62 = vector.load %arg7[%c1_54, %c9_55, %c0_56] : memref<18x32x32xf32, #tpu.memory_space<vmem>>, vector<16x16x32xf32>
    %63 = vector.shape_cast %62 : vector<16x16x32xf32> to vector<256x32xf32>
    %64 = arith.truncf %63 : vector<256x32xf32> to vector<256x32xbf16>
    %c5 = arith.constant 5 : index
    %c0_57 = arith.constant 0 : index
    %c0_58 = arith.constant 0 : index
    %65 = vector.load %arg4[%c5, %c0_57, %c0_58] : memref<9x32x8xbf16, #tpu.memory_space<vmem>>, vector<1x32x8xbf16>
    %66 = vector.shape_cast %65 : vector<1x32x8xbf16> to vector<32x8xbf16>
    %cst_59 = arith.constant dense<0.000000e+00> : vector<256x8xf32>
    %67 = tpu.matmul %64, %66, %cst_59 {dimension_numbers = #tpu.dot_dimension_numbers<[1], [0], [0], [1], [0, 0, 1, 1], [], []>} : vector<256x32xbf16>, vector<32x8xbf16>, vector<256x8xf32> -> vector<256x8xf32>
    %68 = arith.addf %61, %67 : vector<256x8xf32>
    %c2_60 = arith.constant 2 : index
    %c7_61 = arith.constant 7 : index
    %c0_62 = arith.constant 0 : index
    %69 = vector.load %arg7[%c2_60, %c7_61, %c0_62] : memref<18x32x32xf32, #tpu.memory_space<vmem>>, vector<16x16x32xf32>
    %70 = vector.shape_cast %69 : vector<16x16x32xf32> to vector<256x32xf32>
    %71 = arith.truncf %70 : vector<256x32xf32> to vector<256x32xbf16>
    %c6 = arith.constant 6 : index
    %c0_63 = arith.constant 0 : index
    %c0_64 = arith.constant 0 : index
    %72 = vector.load %arg4[%c6, %c0_63, %c0_64] : memref<9x32x8xbf16, #tpu.memory_space<vmem>>, vector<1x32x8xbf16>
    %73 = vector.shape_cast %72 : vector<1x32x8xbf16> to vector<32x8xbf16>
    %cst_65 = arith.constant dense<0.000000e+00> : vector<256x8xf32>
    %74 = tpu.matmul %71, %73, %cst_65 {dimension_numbers = #tpu.dot_dimension_numbers<[1], [0], [0], [1], [0, 0, 1, 1], [], []>} : vector<256x32xbf16>, vector<32x8xbf16>, vector<256x8xf32> -> vector<256x8xf32>
    %75 = arith.addf %68, %74 : vector<256x8xf32>
    %c2_66 = arith.constant 2 : index
    %c8_67 = arith.constant 8 : index
    %c0_68 = arith.constant 0 : index
    %76 = vector.load %arg7[%c2_66, %c8_67, %c0_68] : memref<18x32x32xf32, #tpu.memory_space<vmem>>, vector<16x16x32xf32>
    %77 = vector.shape_cast %76 : vector<16x16x32xf32> to vector<256x32xf32>
    %78 = arith.truncf %77 : vector<256x32xf32> to vector<256x32xbf16>
    %c7_69 = arith.constant 7 : index
    %c0_70 = arith.constant 0 : index
    %c0_71 = arith.constant 0 : index
    %79 = vector.load %arg4[%c7_69, %c0_70, %c0_71] : memref<9x32x8xbf16, #tpu.memory_space<vmem>>, vector<1x32x8xbf16>
    %80 = vector.shape_cast %79 : vector<1x32x8xbf16> to vector<32x8xbf16>
    %cst_72 = arith.constant dense<0.000000e+00> : vector<256x8xf32>
    %81 = tpu.matmul %78, %80, %cst_72 {dimension_numbers = #tpu.dot_dimension_numbers<[1], [0], [0], [1], [0, 0, 1, 1], [], []>} : vector<256x32xbf16>, vector<32x8xbf16>, vector<256x8xf32> -> vector<256x8xf32>
    %82 = arith.addf %75, %81 : vector<256x8xf32>
    %c2_73 = arith.constant 2 : index
    %c9_74 = arith.constant 9 : index
    %c0_75 = arith.constant 0 : index
    %83 = vector.load %arg7[%c2_73, %c9_74, %c0_75] : memref<18x32x32xf32, #tpu.memory_space<vmem>>, vector<16x16x32xf32>
    %84 = vector.shape_cast %83 : vector<16x16x32xf32> to vector<256x32xf32>
    %85 = arith.truncf %84 : vector<256x32xf32> to vector<256x32xbf16>
    %c8_76 = arith.constant 8 : index
    %c0_77 = arith.constant 0 : index
    %c0_78 = arith.constant 0 : index
    %86 = vector.load %arg4[%c8_76, %c0_77, %c0_78] : memref<9x32x8xbf16, #tpu.memory_space<vmem>>, vector<1x32x8xbf16>
    %87 = vector.shape_cast %86 : vector<1x32x8xbf16> to vector<32x8xbf16>
    %cst_79 = arith.constant dense<0.000000e+00> : vector<256x8xf32>
    %88 = tpu.matmul %85, %87, %cst_79 {dimension_numbers = #tpu.dot_dimension_numbers<[1], [0], [0], [1], [0, 0, 1, 1], [], []>} : vector<256x32xbf16>, vector<32x8xbf16>, vector<256x8xf32> -> vector<256x8xf32>
    %89 = arith.addf %82, %88 : vector<256x8xf32>
    %c0_80 = arith.constant 0 : index
    %c0_81 = arith.constant 0 : index
    %90 = vector.load %arg5[%c0_80, %c0_81] : memref<1x8xf32, #tpu.memory_space<vmem>>, vector<1x8xf32>
    %91 = vector.broadcast %90 : vector<1x8xf32> to vector<256x8xf32>
    %92 = arith.addf %89, %91 : vector<256x8xf32>
    %cst_82 = arith.constant 0.000000e+00 : f32
    %93 = vector.broadcast %cst_82 : f32 to vector<256x8xf32>
    %94 = arith.cmpf oge, %92, %93 : vector<256x8xf32>
    %cst_83 = arith.constant 2.000000e-01 : f32
    %95 = vector.broadcast %cst_83 : f32 to vector<256x8xf32>
    %96 = arith.mulf %95, %92 : vector<256x8xf32>
    %97 = arith.select %94, %92, %96 : vector<256x8xi1>, vector<256x8xf32>
    %c0_84 = arith.constant 0 : index
    %c0_85 = arith.constant 0 : index
    %c0_86 = arith.constant 0 : index
    %98 = vector.load %arg6[%c0_84, %c0_85, %c0_86] : memref<1x256x8xf32, #tpu.memory_space<vmem>>, vector<1x256x8xf32>
    %99 = vector.shape_cast %98 : vector<1x256x8xf32> to vector<256x8xf32>
    %100 = vector.shape_cast %97 : vector<256x8xf32> to vector<1x256x8xf32>
    tpu.vector_store %arg6[%c0_84, %c0_85, %c0_86], %100 {strides = array<i32>} : memref<1x256x8xf32, #tpu.memory_space<vmem>>, vector<1x256x8xf32>,
    return
  }
  func.func @transform_0(%arg0: i32) -> (i32, i32, i32) {
    %c0_i32 = arith.constant 0 : i32
    %c0_i32_0 = arith.constant 0 : i32
    %c0_i32_1 = arith.constant 0 : i32
    return %arg0, %c0_i32, %c0_i32_0 : i32, i32, i32
  }
  func.func @transform_1(%arg0: i32) -> (i32, i32) {
    %c0_i32 = arith.constant 0 : i32
    %c0_i32_0 = arith.constant 0 : i32
    %c0_i32_1 = arith.constant 0 : i32
    return %c0_i32, %c0_i32_0 : i32, i32
  }
  func.func @transform_2(%arg0: i32) -> (i32, i32) {
    %c0_i32 = arith.constant 0 : i32
    %c0_i32_0 = arith.constant 0 : i32
    %c0_i32_1 = arith.constant 0 : i32
    return %c0_i32, %c0_i32_0 : i32, i32
  }
  func.func @transform_3(%arg0: i32) -> (i32, i32, i32) {
    %c0_i32 = arith.constant 0 : i32
    %c0_i32_0 = arith.constant 0 : i32
    %c0_i32_1 = arith.constant 0 : i32
    %c0_i32_2 = arith.constant 0 : i32
    return %c0_i32, %c0_i32_0, %c0_i32_1 : i32, i32, i32
  }
  func.func @transform_4(%arg0: i32) -> (i32, i32) {
    %c0_i32 = arith.constant 0 : i32
    %c0_i32_0 = arith.constant 0 : i32
    %c0_i32_1 = arith.constant 0 : i32
    return %c0_i32, %c0_i32_0 : i32, i32
  }
  func.func @transform_5(%arg0: i32) -> (i32, i32, i32) {
    %c0_i32 = arith.constant 0 : i32
    %c0_i32_0 = arith.constant 0 : i32
    %c0_i32_1 = arith.constant 0 : i32
    return %arg0, %c0_i32, %c0_i32_0 : i32, i32, i32
  }
}

</mosaic_0001>

<bundles_post_ra>
// kernel: predictor_forward.1
= control target key start
LH: loop header
LB: loop body
LE: loop exit
PB: predicated region body
PF: predicated region fallthrough
CT: control target
= control target key end

     0   :  { %s4811_s18 = smov 0   ;;  %s5604_s0 = inlined_call_operand.vmem [shape: bf16[2,256,128], index: 0, kind: input, shape index: {}]   ;;  %s5605_s1 = inlined_call_operand.vmem [shape: bf16[128,32], index: 1, kind: input, shape index: {}]   ;;  %s5606_s2 = inlined_call_operand.vmem [shape: f32[1,32], index: 2, kind: input, shape index: {}]   ;;  %s5607_s3 = inlined_call_operand.vmem [shape: bf16[9,32,8], index: 3, kind: input, shape index: {}]   ;;  %s5608_s4 = inlined_call_operand.vmem [shape: f32[1,8], index: 4, kind: input, shape index: {}]   ;;  %s5609_s5 = inlined_call_operand.vmem [shape: f32[2,256,8], index: 5, kind: output, shape index: {}]  }
   0x1 LB: > { %s3670_s19 = sadd.s32 4294967295, %s4778_s18   ;;  %p3674_p0 = scmp.ge.s32.totalorder %s4778_s18, 1  ;;  %s4778_s18 = sphi %s4811_s18, %s15_s18  }
   0x2   : > { %p187_p1 = scmp.lt.s32.totalorder %s4778_s18, 3 }
   0x4   : > { %p188_p2 = pnand %p3674_p0, %p187_p1 }
   0x5   : > { %v4730_v0 = vld [vmem:[%s5605_s1] sm:$0xff] (!%p188_p2)   ;;  %p215_p3 = scmp.lt.s32.totalorder (!%p188_p2), %s3670_s19, 1  ;;  %v4731_v1 = vld [vmem:[%s5605_s1 + $0x8] sm:$0xff] (!%p188_p2)   ;;  %v4732_v2 = vld [vmem:[%s5605_s1 + $0x10] sm:$0xff] (!%p188_p2)   ;;  %vm682_vm0 = vcmask (!%p188_p2), 261120   ;;  %v4780_v24 = vmov (!%p188_p2), 0.0  }
   0x6   : > { %191 = sbr.rel (%p188_p2) target bundleno = 869 (0x365), region = 40  ;;  %4089 = vmatprep.subr.bf16.mxu0 (!%p188_p2), %v4730_v0  ;;  %v4733_v3 = vld [vmem:[%s5605_s1 + $0x18] sm:$0xff] (!%p188_p2)   ;;  %v4734_v5 = vld [vmem:[%s5605_s1 + $0x20] sm:$0xff] (!%p188_p2)   ;;  %v4735_v6 = vld [vmem:[%s5605_s1 + $0x28] sm:$0xff] (!%p188_p2)   ;;  %719 = vst.msk [vmem:[#allocation2 + $0x8] sm:$0xff] (!%p188_p2), %vm682_vm0, %v4780_v24 }
   0x7   : > { %4090 = vmatpush3.bf16.msra.mxu0 (!%p188_p2), %v4730_v0  ;;  %v4736_v7 = vld [vmem:[%s5605_s1 + $0x30] sm:$0xff] (!%p188_p2)   ;;  %v4737_v8 = vld [vmem:[%s5605_s1 + $0x38] sm:$0xff] (!%p188_p2)   ;;  %720 = vst.msk [vmem:[#allocation2 + $0x10] sm:$0xff] (!%p188_p2), %vm682_vm0, %v4780_v24  ;;  %683 = vst.msk [vmem:[#allocation2] sm:$0xff] (!%p188_p2), %vm682_vm0, %v4780_v24 }
   0x8   : > { %4091 = vmatprep.subr.bf16.mxu0 (!%p188_p2), %v4731_v1  ;;  %684 = vst.msk [vmem:[#allocation2 + $0x20] sm:$0xff] (!%p188_p2), %vm682_vm0, %v4780_v24  ;;  %685 = vst.msk [vmem:[#allocation2 + $0x40] sm:$0xff] (!%p188_p2), %vm682_vm0, %v4780_v24  ;;  %v4754_v25 = vld [vmem:[%s5607_s3 + $0x10] sm:$0xff] (!%p188_p2)   ;;  %v4755_v26 = vld [vmem:[%s5607_s3 + $0x18] sm:$0xff] (!%p188_p2)  }
   0x9   : > { %686 = vst.msk [vmem:[#allocation2 + $0x60] sm:$0xff] (!%p188_p2), %vm682_vm0, %v4780_v24  ;;  %687 = vst.msk [vmem:[#allocation2 + $0x80] sm:$0xff] (!%p188_p2), %vm682_vm0, %v4780_v24  ;;  %v4917_v30 = vld [vmem:[%s5607_s3 + $0x30] sm:$0xff] (!%p188_p2)   ;;  %v4923_v31 = vld [vmem:[%s5607_s3 + $0x38] sm:$0xff] (!%p188_p2)  }
   0xa   : > { %688 = vst.msk [vmem:[#allocation2 + $0xa0] sm:$0xff] (!%p188_p2), %vm682_vm0, %v4780_v24  ;;  %689 = vst.msk [vmem:[#allocation2 + $0xc0] sm:$0xff] (!%p188_p2), %vm682_vm0, %v4780_v24  ;;  %4461 = vmatprep.subr.bf16.mxu1 (!%p188_p2), %v4917_v30  ;;  %v4931_v32 = vld [vmem:[%s5607_s3] sm:$0xff] (!%p188_p2)  }
   0xb   : > { %4092 = vmatpush3.bf16.msra.mxu0 (!%p188_p2), %v4731_v1  ;;  %690 = vst.msk [vmem:[#allocation2 + $0xe0] sm:$0xff] (!%p188_p2), %vm682_vm0, %v4780_v24  ;;  %691 = vst.msk [vmem:[#allocation2 + $0x100] sm:$0xff] (!%p188_p2), %vm682_vm0, %v4780_v24  ;;  %4463 = vmatpush3.bf16.msra.mxu1 (!%p188_p2), %v4917_v30  ;;  %v4936_v33 = vld [vmem:[%s5607_s3 + $0x40] sm:$0xff] (!%p188_p2)  }
   0xc   : > { %4093 = vmatprep.subr.bf16.mxu0 (!%p188_p2), %v4732_v2  ;;  %692 = vst.msk [vmem:[#allocation2 + $0x120] sm:$0xff] (!%p188_p2), %vm682_vm0, %v4780_v24  ;;  %693 = vst.msk [vmem:[#allocation2 + $0x140] sm:$0xff] (!%p188_p2), %vm682_vm0, %v4780_v24  ;;  %4462 = vmatprep.subr.bf16.mxu1 (!%p188_p2), %v4923_v31  ;;  %v4943_v34 = vld [vmem:[%s5606_s2] ss:$0 sm:$0xff] (!%p188_p2) }
   0xd   : > { %s5611_s19 = smov (!%p215_p3, %s3670_s19), 1  ;;  %694 = vst.msk [vmem:[#allocation2 + $0x160] sm:$0xff] %vm682_vm0, %v4780_v24  ;;  %695 = vst.msk [vmem:[#allocation2 + $0x180] sm:$0xff] %vm682_vm0, %v4780_v24  ;;  %v809_v27 = vld [vmem:[#allocation2 + $0x8] sm:$0xff] }
   0xe   : > { %s3901_s26 = sshll.u32 %s5611_s19, 7  ;;  %696 = vst.msk [vmem:[#allocation2 + $0x1a0] sm:$0xff] %vm682_vm0, %v4780_v24  ;;  %697 = vst.msk [vmem:[#allocation2 + $0x1c0] sm:$0xff] %vm682_vm0, %v4780_v24  ;;  %v810_v28 = vld [vmem:[#allocation2 + $0x10] sm:$0xff]  ;;  %s3902_s9 = sshll.u32 %s5611_s19, 8 }
   0xf   : > { %s4834_s29 = scalar_lea.vmem %s5604_s0, %s3901_s26  ;;  %4094 = vmatpush3.bf16.msra.mxu0 %v4732_v2  ;;  %698 = vst.msk [vmem:[#allocation2 + $0x1e0] sm:$0xff] %vm682_vm0, %v4780_v24  ;;  %699 = vst.msk [vmem:[#allocation2 + $0x200] sm:$0xff] %vm682_vm0, %v4780_v24  ;;  %v841_v29 = vpack.c.bf16 %v810_v28, %v809_v27  ;;  %4464 = vmatpush3.bf16.msra.mxu1 %v4923_v31  ;;  %s5481_s12 = scalar_lea.vmem %s5609_s5, %s3902_s9 }
  0x10   : > { %v4738_v4 = vld [vmem:[%s4834_s29] sm:$0xff]   ;;  %4095 = vmatprep.subr.bf16.mxu0 %v4733_v3  ;;  %v4739_v9 = vld [vmem:[%s4834_s29 + $0x8] sm:$0xff]   ;;  %v4740_v10 = vld [vmem:[%s4834_s29 + $0x10] sm:$0xff]   ;;  %700 = vst.msk [vmem:[#allocation2 + $0x220] sm:$0xff] %vm682_vm0, %v4780_v24  ;;  %4281 = vmatprep.subr.bf16.mxu1 %v4936_v33 }
  0x11   : > { %4105 = vmatprep.mubr.bf16.mxu0 %v4738_v4  ;;  %v4741_v11 = vld [vmem:[%s4834_s29 + $0x18] sm:$0xff]   ;;  %v4742_v12 = vld [vmem:[%s4834_s29 + $0x20] sm:$0xff]   ;;  %v4743_v13 = vld [vmem:[%s4834_s29 + $0x28] sm:$0xff]   ;;  %701 = vst.msk [vmem:[#allocation2 + $0x18] sm:$0xff] %vm682_vm0, %v4780_v24 }
  0x12   : > { %v4744_v14 = vld [vmem:[%s4834_s29 + $0x30] sm:$0xff]   ;;  %v4745_v15 = vld [vmem:[%s4834_s29 + $0x38] sm:$0xff]   ;;  %v4746_v16 = vld [vmem:[%s4834_s29 + $0x40] sm:$0xff]   ;;  %702 = vst.msk [vmem:[#allocation2 + $0x38] sm:$0xff] %vm682_vm0, %v4780_v24 }
  0x13   : > { %4096 = vmatpush3.bf16.msra.mxu0 %v4733_v3  ;;  %v4747_v17 = vld [vmem:[%s4834_s29 + $0x48] sm:$0xff]   ;;  %v4748_v18 = vld [vmem:[%s4834_s29 + $0x50] sm:$0xff]   ;;  %v4749_v19 = vld [vmem:[%s4834_s29 + $0x58] sm:$0xff]   ;;  %703 = vst.msk [vmem:[#allocation2 + $0x58] sm:$0xff] %vm682_vm0, %v4780_v24 }
  0x14   : > { %4097 = vmatprep.subr.bf16.mxu0 %v4734_v5  ;;  %v4750_v20 = vld [vmem:[%s4834_s29 + $0x60] sm:$0xff]   ;;  %v4751_v21 = vld [vmem:[%s4834_s29 + $0x68] sm:$0xff]   ;;  %v4752_v22 = vld [vmem:[%s4834_s29 + $0x70] sm:$0xff]   ;;  %704 = vst.msk [vmem:[#allocation2 + $0x78] sm:$0xff] %vm682_vm0, %v4780_v24 }
  0x15   : > { %v4753_v23 = vld [vmem:[%s4834_s29 + $0x78] sm:$0xff]   ;;  %705 = vst.msk [vmem:[#allocation2 + $0x98] sm:$0xff] %vm682_vm0, %v4780_v24  ;;  %706 = vst.msk [vmem:[#allocation2 + $0xb8] sm:$0xff] %vm682_vm0, %v4780_v24 }
  0x16   : > { %707 = vst.msk [vmem:[#allocation2 + $0xd8] sm:$0xff] %vm682_vm0, %v4780_v24  ;;  %708 = vst.msk [vmem:[#allocation2 + $0xf8] sm:$0xff] %vm682_vm0, %v4780_v24 }
  0x17   : > { %4098 = vmatpush3.bf16.msra.mxu0 %v4734_v5  ;;  %709 = vst.msk [vmem:[#allocation2 + $0x118] sm:$0xff] %vm682_vm0, %v4780_v24  ;;  %710 = vst.msk [vmem:[#allocation2 + $0x138] sm:$0xff] %vm682_vm0, %v4780_v24 }
  0x18   : > { %4099 = vmatprep.subr.bf16.mxu0 %v4735_v6  ;;  %711 = vst.msk [vmem:[#allocation2 + $0x158] sm:$0xff] %vm682_vm0, %v4780_v24  ;;  %712 = vst.msk [vmem:[#allocation2 + $0x178] sm:$0xff] %vm682_vm0, %v4780_v24 }
  0x19   : > { %713 = vst.msk [vmem:[#allocation2 + $0x198] sm:$0xff] %vm682_vm0, %v4780_v24  ;;  %714 = vst.msk [vmem:[#allocation2 + $0x1b8] sm:$0xff] %vm682_vm0, %v4780_v24 }
  0x1a   : > { %715 = vst.msk [vmem:[#allocation2 + $0x1d8] sm:$0xff] %vm682_vm0, %v4780_v24  ;;  %716 = vst.msk [vmem:[#allocation2 + $0x1f8] sm:$0xff] %vm682_vm0, %v4780_v24 }
  0x1b   : > { %4100 = vmatpush3.bf16.msra.mxu0 %v4735_v6  ;;  %717 = vst.msk [vmem:[#allocation2 + $0x218] sm:$0xff] %vm682_vm0, %v4780_v24  ;;  %718 = vst.msk [vmem:[#allocation2 + $0x238] sm:$0xff] %vm682_vm0, %v4780_v24 }
  0x1c   : > { %4101 = vmatprep.subr.bf16.mxu0 %v4736_v7  ;;  %722 = vst.msk [vmem:[#allocation2 + $0x228] sm:$0xff] %vm682_vm0, %v4780_v24  ;;  %723 = vst.msk [vmem:[#allocation2 + $0x230] sm:$0xff] %vm682_vm0, %v4780_v24 }
  0x1f   : > { %4102 = vmatpush3.bf16.msra.mxu0 %v4736_v7 }
  0x20   : > { %4103 = vmatprep.subr.bf16.mxu0 %v4737_v8 }
  0x23   : > { %4104 = vmatpush3.bf16.msra.mxu0 %v4737_v8 }
  0x24   : > { %4137 = vmatprep.subr.bf16.mxu0 %v4754_v25 }
  0x26   : > { %4106 = vmatmul.mubr.bf16.vlgmr.msra.gmra.mrb[0].mxu0 %v4739_v9 }
  0x27   : > { %4109 = vmatprep.mubr.bf16.mxu0 %v4740_v10  ;;  %4138 = vmatpush3.bf16.msra.mxu0 %v4754_v25 }
  0x28   : > { %4139 = vmatprep.subr.bf16.mxu0 %v4755_v26 }
  0x2b   : > { %4140 = vmatpush3.bf16.msra.mxu0 %v4755_v26 }
  0x2c   : > { %4173 = vmatprep.subr.bf16.mxu0 %v4931_v32 }
  0x2e   : > { %4110 = vmatmul.mubr.bf16.gmra.mrb[4].mxu0 %v4741_v11  ;;  %v4760_v11 = vld [vmem:[%s5607_s3 + $0x8] sm:$0xff]  }
  0x2f   : > { %4113 = vmatprep.mubr.bf16.mxu0 %v4742_v12 }
  0x36   : > { %4114 = vmatmul.mubr.bf16.gmra.mrb[8].mxu0 %v4743_v13 }
  0x37   : > { %4117 = vmatprep.mubr.bf16.mxu0 %v4744_v14 }
  0x3e   : > { %4118 = vmatmul.mubr.bf16.gmra.mrb[12].mxu0 %v4745_v15 }
  0x3f   : > { %4121 = vmatprep.mubr.bf16.mxu0 %v4746_v16 }
  0x46   : > { %4122 = vmatmul.mubr.bf16.gmra.mrb[16].mxu0 %v4747_v17 }
  0x47   : > { %4125 = vmatprep.mubr.bf16.mxu0 %v4748_v18 }
  0x4e   : > { %4126 = vmatmul.mubr.bf16.gmra.mrb[20].mxu0 %v4749_v19 }
  0x4f   : > { %4129 = vmatprep.mubr.bf16.mxu0 %v4750_v20 }
  0x56   : > { %4130 = vmatmul.mubr.bf16.gmra.mrb[24].mxu0 %v4751_v21 }
  0x57   : > { %4133 = vmatprep.mubr.bf16.mxu0 %v4752_v22  ;;  %v4980_v22 = vld [vmem:[%s5607_s3 + $0x20] sm:$0xff]  }
  0x5e   : > { %4134 = vmatmul.mubr.bf16.gmra.mrb[28].mxu0 %v4753_v23 }
  0x5f   : > { %4141 = vmatprep.mubr.msk.bf16.mxu0 %vm682_vm0, %v841_v29 }
  0xf9   : > { %v4107_v35 = vpop.f32.mrb[0].mxu0 }
  0xfa   : > { %v468_v36 = vadd.f32 %v4107_v35, %v4943_v34  ;;  %v459_v37 = vpop.f32.mrb[1].mxu0 }
  0xfb   : > { %v460_v38 = vadd.f32 %v4943_v34, %v459_v37  ;;  %v4108_v39 = vpop.f32.mrb[2].mxu0 }
  0xfc   : > { %vm588_vm1 = vcmp.ge.f32.partialorder %v468_v36, 0.0  ;;  %v620_v40 = vmul.f32 0.2, %v468_v36  ;;  %v471_v41 = vadd.f32 %v4108_v39, %v4943_v34  ;;  %v462_v42 = vpop.f32.mrb[3].mxu0 }
  0xfd   : > { %vm586_vm2 = vcmp.ge.f32.partialorder %v460_v38, 0.0  ;;  %v618_v43 = vmul.f32 0.2, %v460_v38  ;;  %v463_v44 = vadd.f32 %v4943_v34, %v462_v42 }
  0xfe   : > { %v652_v45 = vsel %vm588_vm1, %v468_v36, %v620_v40  ;;  %vm589_vm3 = vcmp.ge.f32.partialorder %v471_v41, 0.0  ;;  %v621_v46 = vmul.f32 0.2, %v471_v41 }
  0xff   : > { %727 = vst.msk [vmem:[#allocation2 + $0x48] sm:$0xff] %vm682_vm0, %v652_v45  ;;  %v650_v47 = vsel %vm586_vm2, %v460_v38, %v618_v43  ;;  %vm587_vm4 = vcmp.ge.f32.partialorder %v463_v44, 0.0  ;;  %v619_v48 = vmul.f32 0.2, %v463_v44 }
 0x100   : > { %725 = vst.msk [vmem:[#allocation2 + $0x28] sm:$0xff] %vm682_vm0, %v650_v47  ;;  %v653_v49 = vsel %vm589_vm3, %v471_v41, %v621_v46 }
 0x101   : > { %728 = vst.msk [vmem:[#allocation2 + $0x50] sm:$0xff] %vm682_vm0, %v653_v49  ;;  %v651_v50 = vsel %vm587_vm4, %v463_v44, %v619_v48  ;;  %v4111_v51 = vpop.f32.mrb[4].mxu0 }
 0x102   : > { %726 = vst.msk [vmem:[#allocation2 + $0x30] sm:$0xff] %vm682_vm0, %v651_v50  ;;  %v484_v52 = vadd.f32 %v4111_v51, %v4943_v34  ;;  %v475_v53 = vpop.f32.mrb[5].mxu0 }
 0x103   : > { %v476_v54 = vadd.f32 %v4943_v34, %v475_v53  ;;  %v4112_v55 = vpop.f32.mrb[6].mxu0 }
 0x104   : > { %vm592_vm5 = vcmp.ge.f32.partialorder %v484_v52, 0.0  ;;  %v624_v56 = vmul.f32 0.2, %v484_v52  ;;  %v487_v57 = vadd.f32 %v4112_v55, %v4943_v34  ;;  %v478_v58 = vpop.f32.mrb[7].mxu0 }
 0x105   : > { %vm590_vm6 = vcmp.ge.f32.partialorder %v476_v54, 0.0  ;;  %v622_v59 = vmul.f32 0.2, %v476_v54  ;;  %v479_v60 = vadd.f32 %v4943_v34, %v478_v58 }
 0x106   : > { %v656_v61 = vsel %vm592_vm5, %v484_v52, %v624_v56  ;;  %vm593_vm7 = vcmp.ge.f32.partialorder %v487_v57, 0.0  ;;  %v625_v62 = vmul.f32 0.2, %v487_v57  ;;  %v813_v10 = vld [vmem:[#allocation2 + $0x48] sm:$0xff] }
 0x107   : > { %731 = vst.msk [vmem:[#allocation2 + $0x88] sm:$0xff] %vm682_vm0, %v656_v61  ;;  %v654_v63 = vsel %vm590_vm6, %v476_v54, %v622_v59  ;;  %vm591_vm8 = vcmp.ge.f32.partialorder %v479_v60, 0.0  ;;  %v623_v0 = vmul.f32 0.2, %v479_v60  ;;  %v811_v5 = vld [vmem:[#allocation2 + $0x28] sm:$0xff] }
 0x108   : > { %729 = vst.msk [vmem:[#allocation2 + $0x68] sm:$0xff] %vm682_vm0, %v654_v63  ;;  %v657_v1 = vsel %vm593_vm7, %v487_v57, %v625_v62  ;;  %v814_v2 = vld [vmem:[#allocation2 + $0x50] sm:$0xff] }
 0x109   : > { %732 = vst.msk [vmem:[#allocation2 + $0x90] sm:$0xff] %vm682_vm0, %v657_v1  ;;  %v655_v3 = vsel %vm591_vm8, %v479_v60, %v623_v0  ;;  %v4115_v4 = vpop.f32.mrb[8].mxu0  ;;  %v812_v6 = vld [vmem:[#allocation2 + $0x30] sm:$0xff]  ;;  %v4968_v14 = vpack.c.bf16 %v814_v2, %v813_v10 }
 0x10a   : > { %730 = vst.msk [vmem:[#allocation2 + $0x70] sm:$0xff] %vm682_vm0, %v655_v3  ;;  %v500_v7 = vadd.f32 %v4115_v4, %v4943_v34  ;;  %v491_v8 = vpop.f32.mrb[9].mxu0  ;;  %v4962_v9 = vpack.c.bf16 %v812_v6, %v811_v5 }
 0x10b   : > { %v492_v12 = vadd.f32 %v4943_v34, %v491_v8  ;;  %v4116_v13 = vpop.f32.mrb[10].mxu0 }
 0x10c   : > { %vm596_vm9 = vcmp.ge.f32.partialorder %v500_v7, 0.0  ;;  %v628_v15 = vmul.f32 0.2, %v500_v7  ;;  %v503_v16 = vadd.f32 %v4116_v13, %v4943_v34  ;;  %v494_v17 = vpop.f32.mrb[11].mxu0  ;;  %4142 = vmatmul.mubr.msk.bf16.vlgmr.msra.gmra.mrb[32].mxu0 %vm682_vm0, %v4962_v9 }
 0x10d   : > { %vm594_vm10 = vcmp.ge.f32.partialorder %v492_v12, 0.0  ;;  %v626_v18 = vmul.f32 0.2, %v492_v12  ;;  %v495_v19 = vadd.f32 %v4943_v34, %v494_v17  ;;  %4145 = vmatprep.mubr.msk.bf16.mxu0 %vm682_vm0, %v4968_v14  ;;  %4174 = vmatpush3.bf16.msra.mxu0 %v4931_v32 }
 0x10e   : > { %v660_v20 = vsel %vm596_vm9, %v500_v7, %v628_v15  ;;  %vm597_vm11 = vcmp.ge.f32.partialorder %v503_v16, 0.0  ;;  %v629_v21 = vmul.f32 0.2, %v503_v16  ;;  %4175 = vmatprep.subr.bf16.mxu0 %v4760_v11  ;;  %v817_v38 = vld [vmem:[#allocation2 + $0x88] sm:$0xff] }
 0x10f   : > { %735 = vst.msk [vmem:[#allocation2 + $0xc8] sm:$0xff] %vm682_vm0, %v660_v20  ;;  %v658_v23 = vsel %vm594_vm10, %v492_v12, %v626_v18  ;;  %vm595_vm12 = vcmp.ge.f32.partialorder %v495_v19, 0.0  ;;  %v627_v24 = vmul.f32 0.2, %v495_v19  ;;  %v815_v29 = vld [vmem:[#allocation2 + $0x68] sm:$0xff] }
 0x110   : > { %733 = vst.msk [vmem:[#allocation2 + $0xa8] sm:$0xff] %vm682_vm0, %v658_v23  ;;  %v661_v25 = vsel %vm597_vm11, %v503_v16, %v629_v21  ;;  %v818_v26 = vld [vmem:[#allocation2 + $0x90] sm:$0xff] }
 0x111   : > { %736 = vst.msk [vmem:[#allocation2 + $0xd0] sm:$0xff] %vm682_vm0, %v661_v25  ;;  %v659_v27 = vsel %vm595_vm12, %v495_v19, %v627_v24  ;;  %v4119_v28 = vpop.f32.mrb[12].mxu0  ;;  %v816_v32 = vld [vmem:[#allocation2 + $0x70] sm:$0xff]  ;;  %4176 = vmatpush3.bf16.msra.mxu0 %v4760_v11  ;;  %v4991_v41 = vpack.c.bf16 %v818_v26, %v817_v38 }
 0x112   : > { %734 = vst.msk [vmem:[#allocation2 + $0xb0] sm:$0xff] %vm682_vm0, %v659_v27  ;;  %v516_v35 = vadd.f32 %v4119_v28, %v4943_v34  ;;  %v507_v36 = vpop.f32.mrb[13].mxu0  ;;  %v4987_v37 = vpack.c.bf16 %v816_v32, %v815_v29  ;;  %4209 = vmatprep.subr.bf16.mxu0 %v4980_v22 }
 0x113   : > { %v508_v39 = vadd.f32 %v4943_v34, %v507_v36  ;;  %v4120_v40 = vpop.f32.mrb[14].mxu0 }
 0x114   : > { %vm600_vm13 = vcmp.ge.f32.partialorder %v516_v35, 0.0  ;;  %v632_v42 = vmul.f32 0.2, %v516_v35  ;;  %v519_v43 = vadd.f32 %v4120_v40, %v4943_v34  ;;  %v510_v44 = vpop.f32.mrb[15].mxu0  ;;  %4146 = vmatmul.mubr.msk.bf16.gmra.mrb[36].mxu0 %vm682_vm0, %v4987_v37 }
 0x115   : > { %vm598_vm14 = vcmp.ge.f32.partialorder %v508_v39, 0.0  ;;  %v630_v45 = vmul.f32 0.2, %v508_v39  ;;  %v511_v46 = vadd.f32 %v4943_v34, %v510_v44  ;;  %4149 = vmatprep.mubr.msk.bf16.mxu0 %vm682_vm0, %v4991_v41 }
 0x116   : > { %v664_v47 = vsel %vm600_vm13, %v516_v35, %v632_v42  ;;  %vm601_vm15 = vcmp.ge.f32.partialorder %v519_v43, 0.0  ;;  %v633_v48 = vmul.f32 0.2, %v519_v43  ;;  %v821_v60 = vld [vmem:[#allocation2 + $0xc8] sm:$0xff] }
 0x117   : > { %739 = vst.msk [vmem:[#allocation2 + $0x108] sm:$0xff] %vm682_vm0, %v664_v47  ;;  %v662_v49 = vsel %vm598_vm14, %v508_v39, %v630_v45  ;;  %vm599_vm1 = vcmp.ge.f32.partialorder %v511_v46, 0.0  ;;  %v631_v50 = vmul.f32 0.2, %v511_v46  ;;  %v819_v55 = vld [vmem:[#allocation2 + $0xa8] sm:$0xff] }
 0x118   : > { %737 = vst.msk [vmem:[#allocation2 + $0xe8] sm:$0xff] %vm682_vm0, %v662_v49  ;;  %v665_v51 = vsel %vm601_vm15, %v519_v43, %v633_v48  ;;  %v822_v52 = vld [vmem:[#allocation2 + $0xd0] sm:$0xff] }
 0x119   : > { %740 = vst.msk [vmem:[#allocation2 + $0x110] sm:$0xff] %vm682_vm0, %v665_v51  ;;  %v663_v53 = vsel %vm599_vm1, %v511_v46, %v631_v50  ;;  %v4123_v54 = vpop.f32.mrb[16].mxu0  ;;  %v820_v56 = vld [vmem:[#allocation2 + $0xb0] sm:$0xff]  ;;  %v5007_v63 = vpack.c.bf16 %v822_v52, %v821_v60 }
 0x11a   : > { %738 = vst.msk [vmem:[#allocation2 + $0xf0] sm:$0xff] %vm682_vm0, %v663_v53  ;;  %v532_v57 = vadd.f32 %v4123_v54, %v4943_v34  ;;  %v523_v58 = vpop.f32.mrb[17].mxu0  ;;  %v5004_v59 = vpack.c.bf16 %v820_v56, %v819_v55 }
 0x11b   : > { %v524_v61 = vadd.f32 %v4943_v34, %v523_v58  ;;  %v4124_v62 = vpop.f32.mrb[18].mxu0 }
 0x11c   : > { %vm604_vm2 = vcmp.ge.f32.partialorder %v532_v57, 0.0  ;;  %v636_v0 = vmul.f32 0.2, %v532_v57  ;;  %v535_v1 = vadd.f32 %v4124_v62, %v4943_v34  ;;  %v526_v2 = vpop.f32.mrb[19].mxu0  ;;  %4150 = vmatmul.mubr.msk.bf16.gmra.mrb[40].mxu0 %vm682_vm0, %v5004_v59 }
 0x11d   : > { %vm602_vm3 = vcmp.ge.f32.partialorder %v524_v61, 0.0  ;;  %v634_v3 = vmul.f32 0.2, %v524_v61  ;;  %v527_v4 = vadd.f32 %v4943_v34, %v526_v2  ;;  %4153 = vmatprep.mubr.msk.bf16.mxu0 %vm682_vm0, %v5007_v63 }
 0x11e   : > { %v668_v5 = vsel %vm604_vm2, %v532_v57, %v636_v0  ;;  %vm605_vm4 = vcmp.ge.f32.partialorder %v535_v1, 0.0  ;;  %v637_v6 = vmul.f32 0.2, %v535_v1  ;;  %v825_v20 = vld [vmem:[#allocation2 + $0x108] sm:$0xff] }
 0x11f   : > { %743 = vst.msk [vmem:[#allocation2 + $0x148] sm:$0xff] %vm682_vm0, %v668_v5  ;;  %v666_v7 = vsel %vm602_vm3, %v524_v61, %v634_v3  ;;  %vm603_vm5 = vcmp.ge.f32.partialorder %v527_v4, 0.0  ;;  %v635_v8 = vmul.f32 0.2, %v527_v4  ;;  %v823_v15 = vld [vmem:[#allocation2 + $0xe8] sm:$0xff]  ;;  %vm3582_vm3 = vcmask 64512  }
 0x120   : > { %741 = vst.msk [vmem:[#allocation2 + $0x128] sm:$0xff] %vm682_vm0, %v666_v7  ;;  %v669_v10 = vsel %vm605_vm4, %v535_v1, %v637_v6  ;;  %v826_v11 = vld [vmem:[#allocation2 + $0x110] sm:$0xff] }
 0x121   : > { %744 = vst.msk [vmem:[#allocation2 + $0x150] sm:$0xff] %vm682_vm0, %v669_v10  ;;  %v667_v12 = vsel %vm603_vm5, %v527_v4, %v635_v8  ;;  %v4127_v13 = vpop.f32.mrb[20].mxu0  ;;  %v824_v16 = vld [vmem:[#allocation2 + $0xf0] sm:$0xff]  ;;  %v5023_v24 = vpack.c.bf16 %v826_v11, %v825_v20 }
 0x122   : > { %742 = vst.msk [vmem:[#allocation2 + $0x130] sm:$0xff] %vm682_vm0, %v667_v12  ;;  %v548_v17 = vadd.f32 %v4127_v13, %v4943_v34  ;;  %v539_v18 = vpop.f32.mrb[21].mxu0  ;;  %v5020_v19 = vpack.c.bf16 %v824_v16, %v823_v15 }
 0x123   : > { %v540_v21 = vadd.f32 %v4943_v34, %v539_v18  ;;  %v4128_v23 = vpop.f32.mrb[22].mxu0 }
 0x124   : > { %vm608_vm6 = vcmp.ge.f32.partialorder %v548_v17, 0.0  ;;  %v640_v25 = vmul.f32 0.2, %v548_v17  ;;  %v551_v26 = vadd.f32 %v4128_v23, %v4943_v34  ;;  %v542_v27 = vpop.f32.mrb[23].mxu0  ;;  %4154 = vmatmul.mubr.msk.bf16.gmra.mrb[44].mxu0 %vm682_vm0, %v5020_v19 }
 0x125   : > { %vm606_vm7 = vcmp.ge.f32.partialorder %v540_v21, 0.0  ;;  %v638_v28 = vmul.f32 0.2, %v540_v21  ;;  %v543_v29 = vadd.f32 %v4943_v34, %v542_v27  ;;  %4157 = vmatprep.mubr.msk.bf16.mxu0 %vm682_vm0, %v5023_v24 }
 0x126   : > { %v672_v32 = vsel %vm608_vm6, %v548_v17, %v640_v25  ;;  %vm609_vm8 = vcmp.ge.f32.partialorder %v551_v26, 0.0  ;;  %v641_v35 = vmul.f32 0.2, %v551_v26  ;;  %v829_v49 = vld [vmem:[#allocation2 + $0x148] sm:$0xff] }
 0x127   : > { %747 = vst.msk [vmem:[#allocation2 + $0x188] sm:$0xff] %vm682_vm0, %v672_v32  ;;  %v670_v36 = vsel %vm606_vm7, %v540_v21, %v638_v28  ;;  %vm607_vm9 = vcmp.ge.f32.partialorder %v543_v29, 0.0  ;;  %v639_v38 = vmul.f32 0.2, %v543_v29  ;;  %v827_v44 = vld [vmem:[#allocation2 + $0x128] sm:$0xff] }
 0x128   : > { %745 = vst.msk [vmem:[#allocation2 + $0x168] sm:$0xff] %vm682_vm0, %v670_v36  ;;  %v673_v39 = vsel %vm609_vm8, %v551_v26, %v641_v35  ;;  %v830_v40 = vld [vmem:[#allocation2 + $0x150] sm:$0xff] }
 0x129   : > { %748 = vst.msk [vmem:[#allocation2 + $0x190] sm:$0xff] %vm682_vm0, %v673_v39  ;;  %v671_v42 = vsel %vm607_vm9, %v543_v29, %v639_v38  ;;  %v4131_v43 = vpop.f32.mrb[24].mxu0  ;;  %v828_v45 = vld [vmem:[#allocation2 + $0x130] sm:$0xff]  ;;  %v5039_v52 = vpack.c.bf16 %v830_v40, %v829_v49  ;;  %v757_v39 = vld [vmem:[#allocation2 + $0x7] sm:$0xff] }
 0x12a   : > { %746 = vst.msk [vmem:[#allocation2 + $0x170] sm:$0xff] %vm682_vm0, %v671_v42  ;;  %v564_v46 = vadd.f32 %v4131_v43, %v4943_v34  ;;  %v555_v47 = vpop.f32.mrb[25].mxu0  ;;  %v5036_v48 = vpack.c.bf16 %v828_v45, %v827_v44  ;;  %v758_v40 = vld [vmem:[#allocation2 + $0xf] sm:$0xff] }
 0x12b   : > { %v556_v50 = vadd.f32 %v4943_v34, %v555_v47  ;;  %v4132_v51 = vpop.f32.mrb[26].mxu0  ;;  %v789_v47 = vpack.c.bf16 %v758_v40, %v757_v39  ;;  %v2222_v40 = vld [vmem:[#allocation2 + $0x29] sm:$0xff] }
 0x12c   : > { %vm612_vm10 = vcmp.ge.f32.partialorder %v564_v46, 0.0  ;;  %v644_v53 = vmul.f32 0.2, %v564_v46  ;;  %v567_v54 = vadd.f32 %v4132_v51, %v4943_v34  ;;  %v558_v55 = vpop.f32.mrb[27].mxu0  ;;  %4158 = vmatmul.mubr.msk.bf16.gmra.mrb[48].mxu0 %vm682_vm0, %v5036_v48 }
 0x12d   : > { %vm610_vm11 = vcmp.ge.f32.partialorder %v556_v50, 0.0  ;;  %v642_v56 = vmul.f32 0.2, %v556_v50  ;;  %v559_v57 = vadd.f32 %v4943_v34, %v558_v55  ;;  %4161 = vmatprep.mubr.msk.bf16.mxu0 %vm682_vm0, %v5039_v52  ;;  %v760_v55 = vld [vmem:[#allocation2 + $0x2f] sm:$0xff] }
 0x12e   : > { %v676_v58 = vsel %vm612_vm10, %v564_v46, %v644_v53  ;;  %vm613_vm12 = vcmp.ge.f32.partialorder %v567_v54, 0.0  ;;  %v645_v60 = vmul.f32 0.2, %v567_v54  ;;  %v833_v10 = vld [vmem:[#allocation2 + $0x188] sm:$0xff] }
 0x12f   : > { %751 = vst.msk [vmem:[#allocation2 + $0x1c8] sm:$0xff] %vm682_vm0, %v676_v58  ;;  %v674_v61 = vsel %vm610_vm11, %v556_v50, %v642_v56  ;;  %vm611_vm13 = vcmp.ge.f32.partialorder %v559_v57, 0.0  ;;  %v643_v62 = vmul.f32 0.2, %v559_v57  ;;  %v831_v4 = vld [vmem:[#allocation2 + $0x168] sm:$0xff]  ;;  %v4762_v56 = vld [vmem:[%s5607_s3 + $0x50] sm:$0xff]  }
 0x130   : > { %749 = vst.msk [vmem:[#allocation2 + $0x1a8] sm:$0xff] %vm682_vm0, %v674_v61  ;;  %v677_v0 = vsel %vm613_vm12, %v567_v54, %v645_v60  ;;  %v834_v1 = vld [vmem:[#allocation2 + $0x190] sm:$0xff]  ;;  %v4761_v54 = vld [vmem:[%s5607_s3 + $0x48] sm:$0xff]  }
 0x131   : > { %752 = vst.msk [vmem:[#allocation2 + $0x1d0] sm:$0xff] %vm682_vm0, %v677_v0  ;;  %v675_v2 = vsel %vm611_vm13, %v559_v57, %v643_v62  ;;  %v4135_v3 = vpop.f32.mrb[28].mxu0  ;;  %v832_v5 = vld [vmem:[#allocation2 + $0x170] sm:$0xff]  ;;  %v5055_v13 = vpack.c.bf16 %v834_v1, %v833_v10  ;;  %v759_v58 = vld [vmem:[#allocation2 + $0x27] sm:$0xff] }
 0x132   : > { %750 = vst.msk [vmem:[#allocation2 + $0x1b0] sm:$0xff] %vm682_vm0, %v675_v2  ;;  %v580_v6 = vadd.f32 %v4135_v3, %v4943_v34  ;;  %v571_v7 = vpop.f32.mrb[29].mxu0  ;;  %v5052_v8 = vpack.c.bf16 %v832_v5, %v831_v4  ;;  %v762_v57 = vld [vmem:[#allocation2 + $0x4f] sm:$0xff]  ;;  %v5097_v60 = vpack.c.bf16 %v760_v55, %v759_v58  ;;  %v761_v61 = vld [vmem:[#allocation2 + $0x47] sm:$0xff] }
 0x133   : > { %v572_v11 = vadd.f32 %v4943_v34, %v571_v7  ;;  %v4136_v12 = vpop.f32.mrb[30].mxu0  ;;  %v5099_v62 = vpack.c.bf16 %v762_v57, %v761_v61  ;;  %v764_v0 = vld [vmem:[#allocation2 + $0x6f] sm:$0xff]  ;;  %v5119_v1 = vld [vmem:[%s5607_s3 + $0x60] sm:$0xff]  }
 0x134   : > { %vm616_vm14 = vcmp.ge.f32.partialorder %v580_v6, 0.0  ;;  %v648_v15 = vmul.f32 0.2, %v580_v6  ;;  %v583_v16 = vadd.f32 %v4136_v12, %v4943_v34  ;;  %v574_v17 = vpop.f32.mrb[31].mxu0  ;;  %4162 = vmatmul.mubr.msk.bf16.gmra.mrb[52].mxu0 %vm682_vm0, %v5052_v8  ;;  %v766_v2 = vld [vmem:[#allocation2 + $0x8f] sm:$0xff]  ;;  %v763_v3 = vld [vmem:[#allocation2 + $0x67] sm:$0xff] }
 0x135   : > { %vm614_vm15 = vcmp.ge.f32.partialorder %v572_v11, 0.0  ;;  %v646_v18 = vmul.f32 0.2, %v572_v11  ;;  %v575_v20 = vadd.f32 %v4943_v34, %v574_v17  ;;  %4165 = vmatprep.mubr.msk.bf16.mxu0 %vm682_vm0, %v5055_v13  ;;  %v5121_v4 = vpack.c.bf16 %v764_v0, %v763_v3  ;;  %v765_v5 = vld [vmem:[#allocation2 + $0x87] sm:$0xff]  ;;  %v5222_v57 = vld [vmem:[%s5607_s3 + $0x70] sm:$0xff]  }
 0x136   : > { %v680_v21 = vsel %vm616_vm14, %v580_v6, %v648_v15  ;;  %vm617_vm1 = vcmp.ge.f32.partialorder %v583_v16, 0.0  ;;  %v649_v23 = vmul.f32 0.2, %v583_v16  ;;  %v837_v36 = vld [vmem:[#allocation2 + $0x1c8] sm:$0xff]  ;;  %v1313_v61 = vld [vmem:[#allocation2 + $0x91] sm:$0xff] }
 0x137   : > { %755 = vst.msk [vmem:[#allocation2 + $0x208] sm:$0xff] %vm682_vm0, %v680_v21  ;;  %v678_v25 = vsel %vm614_vm15, %v572_v11, %v646_v18  ;;  %vm615_vm2 = vcmp.ge.f32.partialorder %v575_v20, 0.0  ;;  %v647_v26 = vmul.f32 0.2, %v575_v20  ;;  %v835_v32 = vld [vmem:[#allocation2 + $0x1a8] sm:$0xff] }
 0x138   : > { %753 = vst.msk [vmem:[#allocation2 + $0x1e8] sm:$0xff] %vm682_vm0, %v678_v25  ;;  %v681_v27 = vsel %vm617_vm1, %v583_v16, %v649_v23  ;;  %v838_v28 = vld [vmem:[#allocation2 + $0x1d0] sm:$0xff]  ;;  %v767_v6 = vld [vmem:[#allocation2 + $0xa7] sm:$0xff] }
 0x139   : > { %756 = vst.msk [vmem:[#allocation2 + $0x210] sm:$0xff] %vm682_vm0, %v681_v27  ;;  %v679_v29 = vsel %vm615_vm2, %v575_v20, %v647_v26  ;;  %v836_v34 = vld [vmem:[#allocation2 + $0x1b0] sm:$0xff]  ;;  %v5069_v38 = vpack.c.bf16 %v838_v28, %v837_v36  ;;  %v769_v10 = vld [vmem:[#allocation2 + $0xc7] sm:$0xff] }
 0x13a   : > { %754 = vst.msk [vmem:[#allocation2 + $0x1f0] sm:$0xff] %vm682_vm0, %v679_v29  ;;  %v5067_v35 = vpack.c.bf16 %v836_v34, %v835_v32  ;;  %v771_v12 = vld [vmem:[#allocation2 + $0xe7] sm:$0xff] }
 0x13b   : > { %v773_v16 = vld [vmem:[#allocation2 + $0x107] sm:$0xff] }
 0x13c   : > { %4166 = vmatmul.mubr.msk.bf16.gmra.mrb[56].mxu0 %vm682_vm0, %v5067_v35  ;;  %v775_v18 = vld [vmem:[#allocation2 + $0x127] sm:$0xff] }
 0x13d   : > { %4169 = vmatprep.mubr.msk.bf16.mxu0 %vm682_vm0, %v5069_v38  ;;  %v777_v21 = vld [vmem:[#allocation2 + $0x147] sm:$0xff] }
 0x13e   : > { %v1640_v51 = vld [vmem:[#allocation2 + $0x207] sm:$0xff] }
 0x13f   : > { %v839_v42 = vld [vmem:[#allocation2 + $0x1e8] sm:$0xff] }
 0x140   : > { %v1641_v43 = vld [vmem:[#allocation2 + $0x20f] sm:$0xff]  ;;  %v1638_v45 = vld [vmem:[#allocation2 + $0x1e7] sm:$0xff] }
 0x141   : > { %v840_v44 = vld [vmem:[#allocation2 + $0x1f0] sm:$0xff]  ;;  %v5079_v53 = vpack.c.bf16 %v1641_v43, %v1640_v51  ;;  %v779_v25 = vld [vmem:[#allocation2 + $0x167] sm:$0xff] }
 0x142   : > { %v1639_v46 = vld [vmem:[#allocation2 + $0x1ef] sm:$0xff]  ;;  %v5075_v49 = vpack.c.bf16 %v840_v44, %v839_v42  ;;  %v781_v27 = vld [vmem:[#allocation2 + $0x187] sm:$0xff] }
 0x143   : > { %v5077_v50 = vpack.c.bf16 %v1639_v46, %v1638_v45  ;;  %v783_v29 = vld [vmem:[#allocation2 + $0x1a7] sm:$0xff]  ;;  %v1947_v39 = vld [vmem:[#allocation2 + $0x210] sm:$0xff] }
 0x144   : > { %4170 = vmatmul.mubr.msk.bf16.gmra.mrb[60].mxu0 %vm682_vm0, %v5075_v49  ;;  %v785_v34 = vld [vmem:[#allocation2 + $0x1c7] sm:$0xff]  ;;  %v2223_v42 = vld [vmem:[#allocation2 + $0x31] sm:$0xff] }
 0x145   : > { %4277 = vmatprep.mubr.msk.bf16.mxu1 %vm682_vm0, %v5077_v50  ;;  %4177 = vmatprep.mubr.msk.bf16.mxu0 %vm682_vm0, %v789_v47  ;;  %v1946_v44 = vld [vmem:[#allocation2 + $0x208] sm:$0xff]  ;;  %v2254_v46 = vpack.c.bf16 %v2223_v42, %v2222_v40  ;;  %v1309_v47 = vld [vmem:[#allocation2 + $0x51] sm:$0xff] }
 0x146   : > { %4278 = vmatmul.mubr.msk.bf16.vlgmr.msra.gmra.mrb[0].mxu1 %vm682_vm0, %v5079_v53  ;;  %v5195_v45 = vpack.c.bf16 %v1947_v39, %v1946_v44  ;;  %v2227_v51 = vld [vmem:[#allocation2 + $0x71] sm:$0xff]  ;;  %v4767_v55 = vld [vmem:[%s5607_s3 + $0x68] sm:$0xff]  }
 0x147   : > { %4282 = vmatpush3.bf16.msra.mxu1 %v4936_v33  ;;  %4285 = vmatprep.mubr.msk.bf16.mxu1 %vm682_vm0, %v4962_v9  ;;  %v4763_v33 = vld [vmem:[%s5607_s3 + $0x58] sm:$0xff]   ;;  %v4765_v9 = vld [vmem:[%s5607_s3 + $0x28] sm:$0xff]  }
 0x148   : > { %4283 = vmatprep.subr.bf16.mxu1 %v4761_v54  ;;  %v1312_v58 = vld [vmem:[#allocation2 + $0x89] sm:$0xff]  ;;  %v2251_v39 = vld [vmem:[#allocation2 + $0x1f1] sm:$0xff] }
 0x149   : > { %v5225_v0 = vpack.c.bf16 %v1313_v61, %v1312_v58  ;;  %v2234_v3 = vld [vmem:[#allocation2 + $0xe9] sm:$0xff]  ;;  %v2253_v44 = vld [vmem:[#allocation2 + $0x211] sm:$0xff] }
 0x14a   : > { %v2848_v58 = vld [vmem:[#allocation2 + $0x110] sm:$0xff]  ;;  %v2845_v61 = vld [vmem:[#allocation2 + $0xe8] sm:$0xff] }
 0x14b   : > { %4284 = vmatpush3.bf16.msra.mxu1 %v4761_v54 }
 0x14c   : > { %4317 = vmatprep.subr.bf16.mxu1 %v4762_v56  ;;  %4178 = vmatmul.mubr.msk.bf16.vlgmr.msra.gmra.mrb[32].mxu0 %vm682_vm0, %v5097_v60 }
 0x14d   : > { %4181 = vmatprep.mubr.msk.bf16.mxu0 %vm682_vm0, %v5099_v62  ;;  %4210 = vmatpush3.bf16.msra.mxu0 %v4980_v22  ;;  %v768_v22 = vld [vmem:[#allocation2 + $0xaf] sm:$0xff] }
 0x14e   : > { %4286 = vmatmul.mubr.msk.bf16.vlgmr.msra.gmra.mrb[4].mxu1 %vm682_vm0, %v4968_v14  ;;  %4211 = vmatprep.subr.bf16.mxu0 %v4765_v9  ;;  %v5123_v14 = vpack.c.bf16 %v766_v2, %v765_v5  ;;  %v5135_v7 = vpack.c.bf16 %v768_v22, %v767_v6  ;;  %v1317_v2 = vld [vmem:[#allocation2 + $0xd1] sm:$0xff] }
 0x14f   : > { %4318 = vmatpush3.bf16.msra.mxu1 %v4762_v56  ;;  %4289 = vmatprep.mubr.msk.bf16.mxu1 %vm682_vm0, %v4987_v37  ;;  %v770_v37 = vld [vmem:[#allocation2 + $0xcf] sm:$0xff] }
 0x150   : > { %4319 = vmatprep.subr.bf16.mxu1 %v4763_v33  ;;  %v5137_v11 = vpack.c.bf16 %v770_v37, %v769_v10  ;;  %v1320_v37 = vld [vmem:[#allocation2 + $0x109] sm:$0xff]  ;;  %v1321_v6 = vld [vmem:[#allocation2 + $0x111] sm:$0xff] }
 0x151   : > { %4212 = vmatpush3.bf16.msra.mxu0 %v4765_v9  ;;  %v2231_v9 = vld [vmem:[#allocation2 + $0xb1] sm:$0xff]  ;;  %v2238_v10 = vld [vmem:[#allocation2 + $0x129] sm:$0xff] }
 0x152   : > { %4245 = vmatprep.subr.bf16.mxu0 %v4917_v30 }
 0x153   : > { %4320 = vmatpush3.bf16.msra.mxu1 %v4763_v33  ;;  %v2230_v33 = vld [vmem:[#allocation2 + $0xa9] sm:$0xff] }
 0x154   : > { %4353 = vmatprep.subr.bf16.mxu1 %v5119_v1  ;;  %4182 = vmatmul.mubr.msk.bf16.gmra.mrb[36].mxu0 %vm682_vm0, %v5121_v4 }
 0x155   : > { %4185 = vmatprep.mubr.msk.bf16.mxu0 %vm682_vm0, %v5123_v14 }
 0x156   : > { %4290 = vmatmul.mubr.msk.bf16.gmra.mrb[8].mxu1 %vm682_vm0, %v4991_v41  ;;  %v772_v41 = vld [vmem:[#allocation2 + $0xef] sm:$0xff] }
 0x157   : > { %4293 = vmatprep.mubr.msk.bf16.mxu1 %vm682_vm0, %v5004_v59  ;;  %v774_v59 = vld [vmem:[#allocation2 + $0x10f] sm:$0xff]  ;;  %v5147_v15 = vpack.c.bf16 %v772_v41, %v771_v12 }
 0x158   : > { %v5149_v17 = vpack.c.bf16 %v774_v59, %v773_v16  ;;  %v2239_v41 = vld [vmem:[#allocation2 + $0x131] sm:$0xff]  ;;  %v5251_v59 = vpack.c.bf16 %v1321_v6, %v1320_v37  ;;  %v1324_v16 = vld [vmem:[#allocation2 + $0x149] sm:$0xff] }
 0x159   : > { %v5255_v12 = vpack.c.bf16 %v2239_v41, %v2238_v10  ;;  %v2851_v6 = vld [vmem:[#allocation2 + $0x148] sm:$0xff]  ;;  %v2854_v41 = vld [vmem:[#allocation2 + $0x170] sm:$0xff] }
 0x15c   : > { %4186 = vmatmul.mubr.msk.bf16.gmra.mrb[40].mxu0 %vm682_vm0, %v5135_v7 }
 0x15d   : > { %4189 = vmatprep.mubr.msk.bf16.mxu0 %vm682_vm0, %v5137_v11 }
 0x15e   : > { %4294 = vmatmul.mubr.msk.bf16.gmra.mrb[12].mxu1 %vm682_vm0, %v5007_v63  ;;  %v776_v63 = vld [vmem:[#allocation2 + $0x12f] sm:$0xff] }
 0x15f   : > { %4297 = vmatprep.mubr.msk.bf16.mxu1 %vm682_vm0, %v5020_v19  ;;  %v778_v19 = vld [vmem:[#allocation2 + $0x14f] sm:$0xff]  ;;  %v5159_v20 = vpack.c.bf16 %v776_v63, %v775_v18 }
 0x160   : > { %v5161_v23 = vpack.c.bf16 %v778_v19, %v777_v21  ;;  %v1325_v63 = vld [vmem:[#allocation2 + $0x151] sm:$0xff]  ;;  %v2242_v19 = vld [vmem:[#allocation2 + $0x169] sm:$0xff] }
 0x161   : > { %v2243_v18 = vld [vmem:[#allocation2 + $0x171] sm:$0xff]  ;;  %v5263_v21 = vpack.c.bf16 %v1325_v63, %v1324_v16  ;;  %v2853_v63 = vld [vmem:[#allocation2 + $0x168] sm:$0xff] }
 0x162   : > { %v2856_v16 = vld [vmem:[#allocation2 + $0x190] sm:$0xff] }
 0x164   : > { %4190 = vmatmul.mubr.msk.bf16.gmra.mrb[44].mxu0 %vm682_vm0, %v5147_v15 }
 0x165   : > { %4193 = vmatprep.mubr.msk.bf16.mxu0 %vm682_vm0, %v5149_v17 }
 0x166   : > { %4298 = vmatmul.mubr.msk.bf16.gmra.mrb[16].mxu1 %vm682_vm0, %v5023_v24  ;;  %v780_v24 = vld [vmem:[#allocation2 + $0x16f] sm:$0xff] }
 0x167   : > { %4301 = vmatprep.mubr.msk.bf16.mxu1 %vm682_vm0, %v5036_v48  ;;  %v782_v48 = vld [vmem:[#allocation2 + $0x18f] sm:$0xff]  ;;  %v5171_v26 = vpack.c.bf16 %v780_v24, %v779_v25  ;;  %v5267_v24 = vpack.c.bf16 %v2243_v18, %v2242_v19  ;;  %v2876_v19 = vpack.c.bf16 %v2854_v41, %v2853_v63 }
 0x168   : > { %v5173_v28 = vpack.c.bf16 %v782_v48, %v781_v27  ;;  %v1328_v48 = vld [vmem:[#allocation2 + $0x189] sm:$0xff]  ;;  %v1329_v25 = vld [vmem:[#allocation2 + $0x191] sm:$0xff] }
 0x169   : > { %v2246_v27 = vld [vmem:[#allocation2 + $0x1a9] sm:$0xff] }
 0x16a   : > { %v2855_v18 = vld [vmem:[#allocation2 + $0x188] sm:$0xff] }
 0x16c   : > { %4194 = vmatmul.mubr.msk.bf16.gmra.mrb[48].mxu0 %vm682_vm0, %v5159_v20 }
 0x16d   : > { %4197 = vmatprep.mubr.msk.bf16.mxu0 %vm682_vm0, %v5161_v23 }
 0x16e   : > { %4302 = vmatmul.mubr.msk.bf16.gmra.mrb[20].mxu1 %vm682_vm0, %v5039_v52  ;;  %v784_v52 = vld [vmem:[#allocation2 + $0x1af] sm:$0xff] }
 0x16f   : > { %4305 = vmatprep.mubr.msk.bf16.mxu1 %vm682_vm0, %v5052_v8  ;;  %v786_v8 = vld [vmem:[#allocation2 + $0x1cf] sm:$0xff]  ;;  %v5183_v32 = vpack.c.bf16 %v784_v52, %v783_v29 }
 0x170   : > { %v5185_v36 = vpack.c.bf16 %v786_v8, %v785_v34  ;;  %v2247_v52 = vld [vmem:[#allocation2 + $0x1b1] sm:$0xff]  ;;  %v5275_v8 = vpack.c.bf16 %v1329_v25, %v1328_v48  ;;  %v1332_v34 = vld [vmem:[#allocation2 + $0x1c9] sm:$0xff]  ;;  %v2877_v48 = vpack.c.bf16 %v2856_v16, %v2855_v18 }
 0x171   : > { %v5279_v29 = vpack.c.bf16 %v2247_v52, %v2246_v27  ;;  %v2858_v25 = vld [vmem:[#allocation2 + $0x1b0] sm:$0xff]  ;;  %v2857_v52 = vld [vmem:[#allocation2 + $0x1a8] sm:$0xff] }
 0x172   : > { %v2860_v27 = vld [vmem:[#allocation2 + $0x1d0] sm:$0xff] }
 0x174   : > { %4198 = vmatmul.mubr.msk.bf16.gmra.mrb[52].mxu0 %vm682_vm0, %v5171_v26 }
 0x175   : > { %4201 = vmatprep.mubr.msk.bf16.mxu0 %vm682_vm0, %v5173_v28 }
 0x176   : > { %4306 = vmatmul.mubr.msk.bf16.gmra.mrb[24].mxu1 %vm682_vm0, %v5055_v13  ;;  %v1304_v13 = vld [vmem:[#allocation2 + $0x9] sm:$0xff] }
 0x177   : > { %4309 = vmatprep.mubr.msk.bf16.mxu1 %vm682_vm0, %v5067_v35  ;;  %v1305_v35 = vld [vmem:[#allocation2 + $0x11] sm:$0xff] }
 0x178   : > { %v1336_v43 = vpack.c.bf16 %v1305_v35, %v1304_v13  ;;  %v1333_v13 = vld [vmem:[#allocation2 + $0x1d1] sm:$0xff]  ;;  %v2250_v35 = vld [vmem:[#allocation2 + $0x1e9] sm:$0xff] }
 0x179   : > { %v5287_v40 = vpack.c.bf16 %v1333_v13, %v1332_v34  ;;  %v5291_v42 = vpack.c.bf16 %v2251_v39, %v2250_v35  ;;  %v2878_v34 = vpack.c.bf16 %v2858_v25, %v2857_v52  ;;  %v2859_v13 = vld [vmem:[#allocation2 + $0x1c8] sm:$0xff]  ;;  %v2862_v39 = vld [vmem:[#allocation2 + $0x1f0] sm:$0xff] }
 0x17a   : > { %v2879_v35 = vpack.c.bf16 %v2860_v27, %v2859_v13 }
 0x17c   : > { %4202 = vmatmul.mubr.msk.bf16.gmra.mrb[56].mxu0 %vm682_vm0, %v5183_v32 }
 0x17d   : > { %4205 = vmatprep.mubr.msk.bf16.mxu0 %vm682_vm0, %v5185_v36 }
 0x17e   : > { %4310 = vmatmul.mubr.msk.bf16.gmra.mrb[28].mxu1 %vm682_vm0, %v5069_v38  ;;  %v1308_v38 = vld [vmem:[#allocation2 + $0x49] sm:$0xff] }
 0x17f   : > { %4313 = vmatprep.mubr.msk.bf16.mxu1 %vm682_vm0, %v5075_v49  ;;  %v2226_v49 = vld [vmem:[#allocation2 + $0x69] sm:$0xff]  ;;  %v5203_v54 = vpack.c.bf16 %v1309_v47, %v1308_v38  ;;  %v4769_v38 = vld [vmem:[%s5607_s3 + $0x78] sm:$0xff]  }
 0x180   : > { %v5209_v56 = vpack.c.bf16 %v2227_v51, %v2226_v49  ;;  %v2841_v47 = vld [vmem:[#allocation2 + $0xa8] sm:$0xff] }
 0x181   : > { %v2843_v51 = vld [vmem:[#allocation2 + $0xc8] sm:$0xff] }
 0x184   : > { %4206 = vmatmul.mubr.msk.bf16.gmra.mrb[60].mxu0 %vm682_vm0, %v5077_v50 }
 0x185   : > { %4213 = vmatprep.mubr.msk.bf16.mxu0 %vm682_vm0, %v1336_v43  ;;  %v2252_v43 = vld [vmem:[#allocation2 + $0x209] sm:$0xff] }
 0x186   : > { %4314 = vmatmul.mubr.msk.bf16.gmra.mrb[0].mxu1 %vm682_vm0, %v5195_v45 }
 0x187   : > { %4321 = vmatprep.mubr.msk.bf16.mxu1 %vm682_vm0, %v2254_v46 }
 0x18c   : > { %4214 = vmatmul.mubr.msk.bf16.vlgmr.msra.gmra.mrb[32].mxu0 %vm682_vm0, %v2254_v46  ;;  %v5299_v46 = vpack.c.bf16 %v2253_v44, %v2252_v43  ;;  %v2861_v43 = vld [vmem:[#allocation2 + $0x1e8] sm:$0xff] }
 0x18d   : > { %4217 = vmatprep.mubr.msk.bf16.mxu0 %vm682_vm0, %v5203_v54  ;;  %4246 = vmatpush3.bf16.msra.mxu0 %v4917_v30  ;;  %v5231_v30 = vpack.c.bf16 %v2231_v9, %v2230_v33  ;;  %v2847_v9 = vld [vmem:[#allocation2 + $0x108] sm:$0xff]  ;;  %v2880_v44 = vpack.c.bf16 %v2862_v39, %v2861_v43 }
 0x18e   : > { %4322 = vmatmul.mubr.msk.bf16.vlgmr.msra.gmra.mrb[4].mxu1 %vm682_vm0, %v5203_v54  ;;  %4247 = vmatprep.subr.bf16.mxu0 %v4923_v31 }
 0x18f   : > { %4354 = vmatpush3.bf16.msra.mxu1 %v5119_v1  ;;  %4325 = vmatprep.mubr.msk.bf16.mxu1 %vm682_vm0, %v5209_v56  ;;  %v1316_v1 = vld [vmem:[#allocation2 + $0xc9] sm:$0xff] }
 0x190   : > { %4355 = vmatprep.subr.bf16.mxu1 %v4767_v55  ;;  %v5239_v5 = vpack.c.bf16 %v1317_v2, %v1316_v1  ;;  %v2873_v1 = vpack.c.bf16 %v2848_v58, %v2847_v9  ;;  %v2850_v2 = vld [vmem:[#allocation2 + $0x130] sm:$0xff] }
 0x191   : > { %4248 = vmatpush3.bf16.msra.mxu0 %v4923_v31  ;;  %v2235_v31 = vld [vmem:[#allocation2 + $0xf1] sm:$0xff] }
 0x192   : > { %v5243_v22 = vpack.c.bf16 %v2235_v31, %v2234_v3  ;;  %v2852_v3 = vld [vmem:[#allocation2 + $0x150] sm:$0xff]  ;;  %v2849_v31 = vld [vmem:[#allocation2 + $0x128] sm:$0xff] }
 0x193   : > { %4356 = vmatpush3.bf16.msra.mxu1 %v4767_v55  ;;  %v2874_v37 = vpack.c.bf16 %v2850_v2, %v2849_v31  ;;  %v2875_v10 = vpack.c.bf16 %v2852_v3, %v2851_v6 }
 0x194   : > { %4389 = vmatprep.subr.bf16.mxu1 %v5222_v57  ;;  %4218 = vmatmul.mubr.msk.bf16.gmra.mrb[36].mxu0 %vm682_vm0, %v5209_v56 }
 0x195   : > { %4221 = vmatprep.mubr.msk.bf16.mxu0 %vm682_vm0, %v5225_v0 }
 0x196   : > { %4326 = vmatmul.mubr.msk.bf16.gmra.mrb[8].mxu1 %vm682_vm0, %v5225_v0 }
 0x197   : > { %4329 = vmatprep.mubr.msk.bf16.mxu1 %vm682_vm0, %v5231_v30 }
 0x19c   : > { %4222 = vmatmul.mubr.msk.bf16.gmra.mrb[40].mxu0 %vm682_vm0, %v5231_v30 }
 0x19d   : > { %4225 = vmatprep.mubr.msk.bf16.mxu0 %vm682_vm0, %v5239_v5 }
 0x19e   : > { %4330 = vmatmul.mubr.msk.bf16.gmra.mrb[12].mxu1 %vm682_vm0, %v5239_v5 }
 0x19f   : > { %4333 = vmatprep.mubr.msk.bf16.mxu1 %vm682_vm0, %v5243_v22 }
 0x1a4   : > { %4226 = vmatmul.mubr.msk.bf16.gmra.mrb[44].mxu0 %vm682_vm0, %v5243_v22 }
 0x1a5   : > { %4229 = vmatprep.mubr.msk.bf16.mxu0 %vm682_vm0, %v5251_v59 }
 0x1a6   : > { %4334 = vmatmul.mubr.msk.bf16.gmra.mrb[16].mxu1 %vm682_vm0, %v5251_v59 }
 0x1a7   : > { %4337 = vmatprep.mubr.msk.bf16.mxu1 %vm682_vm0, %v5255_v12 }
 0x1ac   : > { %4230 = vmatmul.mubr.msk.bf16.gmra.mrb[48].mxu0 %vm682_vm0, %v5255_v12 }
 0x1ad   : > { %4233 = vmatprep.mubr.msk.bf16.mxu0 %vm682_vm0, %v5263_v21 }
 0x1ae   : > { %4338 = vmatmul.mubr.msk.bf16.gmra.mrb[20].mxu1 %vm682_vm0, %v5263_v21 }
 0x1af   : > { %4341 = vmatprep.mubr.msk.bf16.mxu1 %vm682_vm0, %v5267_v24 }
 0x1b4   : > { %4234 = vmatmul.mubr.msk.bf16.gmra.mrb[52].mxu0 %vm682_vm0, %v5267_v24 }
 0x1b5   : > { %4237 = vmatprep.mubr.msk.bf16.mxu0 %vm682_vm0, %v5275_v8 }
 0x1b6   : > { %4342 = vmatmul.mubr.msk.bf16.gmra.mrb[24].mxu1 %vm682_vm0, %v5275_v8 }
 0x1b7   : > { %4345 = vmatprep.mubr.msk.bf16.mxu1 %vm682_vm0, %v5279_v29 }
 0x1bc   : > { %4238 = vmatmul.mubr.msk.bf16.gmra.mrb[56].mxu0 %vm682_vm0, %v5279_v29 }
 0x1bd   : > { %4241 = vmatprep.mubr.msk.bf16.mxu0 %vm682_vm0, %v5287_v40 }
 0x1be   : > { %4346 = vmatmul.mubr.msk.bf16.gmra.mrb[28].mxu1 %vm682_vm0, %v5287_v40 }
 0x1bf   : > { %4349 = vmatprep.mubr.msk.bf16.mxu1 %vm682_vm0, %v5291_v42 }
 0x1c4   : > { %4242 = vmatmul.mubr.msk.bf16.gmra.mrb[60].mxu0 %vm682_vm0, %v5291_v42 }
 0x1c5   : > { %4249 = vmatprep.mubr.msk.bf16.mxu0 %vm682_vm0, %v5097_v60  ;;  %v4770_v60 = vld [vmem:[%s5607_s3 + $0x80] sm:$0xff]  }
 0x1c6   : > { %4350 = vmatmul.mubr.msk.bf16.gmra.mrb[0].mxu1 %vm682_vm0, %v5299_v46 }
 0x1c7   : > { %4357 = vmatprep.mubr.msk.bf16.mxu1 %vm682_vm0, %v5099_v62 }
 0x1cc   : > { %4250 = vmatmul.mubr.msk.bf16.vlgmr.msra.gmra.mrb[32].mxu0 %vm682_vm0, %v5099_v62  ;;  %v2559_v62 = vld [vmem:[#allocation2 + $0x227] sm:$0xff] }
 0x1cd   : > { %4253 = vmatprep.mubr.msk.bf16.mxu0 %vm682_vm0, %v5121_v4 }
 0x1ce   : > { %4358 = vmatmul.mubr.msk.bf16.vlgmr.msra.gmra.mrb[4].mxu1 %vm682_vm0, %v5121_v4  ;;  %v2560_v4 = vld [vmem:[#allocation2 + $0x22f] sm:$0xff] }
 0x1cf   : > { %4390 = vmatpush3.bf16.msra.mxu1 %v5222_v57  ;;  %4361 = vmatprep.mubr.msk.bf16.mxu1 %vm682_vm0, %v5123_v14  ;;  %v2846_v57 = vld [vmem:[#allocation2 + $0xf0] sm:$0xff] }
 0x1d0   : > { %4391 = vmatprep.subr.bf16.mxu1 %v4769_v38  ;;  %v2872_v33 = vpack.c.bf16 %v2846_v57, %v2845_v61  ;;  %v5473_v61 = vld [vmem:[%s5608_s4] ss:$0 sm:$0xff] }
 0x1d3   : > { %4392 = vmatpush3.bf16.msra.mxu1 %v4769_v38  ;;  %v2865_v38 = vld [vmem:[#allocation2 + $0x228] sm:$0xff] }
 0x1d4   : > { %4425 = vmatprep.subr.bf16.mxu1 %v4770_v60  ;;  %4254 = vmatmul.mubr.msk.bf16.gmra.mrb[36].mxu0 %vm682_vm0, %v5123_v14  ;;  %v2576_v14 = vpack.c.bf16 %v2560_v4, %v2559_v62 }
 0x1d5   : > { %4257 = vmatprep.mubr.msk.bf16.mxu0 %vm682_vm0, %v5135_v7 }
 0x1d6   : > { %4362 = vmatmul.mubr.msk.bf16.gmra.mrb[8].mxu1 %vm682_vm0, %v5135_v7  ;;  %v2836_v7 = vld [vmem:[#allocation2 + $0x50] sm:$0xff] }
 0x1d7   : > { %4365 = vmatprep.mubr.msk.bf16.mxu1 %vm682_vm0, %v5137_v11 }
 0x1dc   : > { %4258 = vmatmul.mubr.msk.bf16.gmra.mrb[40].mxu0 %vm682_vm0, %v5137_v11  ;;  %v2835_v11 = vld [vmem:[#allocation2 + $0x48] sm:$0xff] }
 0x1dd   : > { %4261 = vmatprep.mubr.msk.bf16.mxu0 %vm682_vm0, %v5147_v15 }
 0x1de   : > { %4366 = vmatmul.mubr.msk.bf16.gmra.mrb[12].mxu1 %vm682_vm0, %v5147_v15  ;;  %v2867_v15 = vpack.c.bf16 %v2836_v7, %v2835_v11 }
 0x1df   : > { %4369 = vmatprep.mubr.msk.bf16.mxu1 %vm682_vm0, %v5149_v17 }
 0x1e4   : > { %4262 = vmatmul.mubr.msk.bf16.gmra.mrb[44].mxu0 %vm682_vm0, %v5149_v17  ;;  %v2838_v17 = vld [vmem:[#allocation2 + $0x70] sm:$0xff] }
 0x1e5   : > { %4265 = vmatprep.mubr.msk.bf16.mxu0 %vm682_vm0, %v5159_v20 }
 0x1e6   : > { %4370 = vmatmul.mubr.msk.bf16.gmra.mrb[16].mxu1 %vm682_vm0, %v5159_v20  ;;  %v2840_v20 = vld [vmem:[#allocation2 + $0x90] sm:$0xff] }
 0x1e7   : > { %4373 = vmatprep.mubr.msk.bf16.mxu1 %vm682_vm0, %v5161_v23 }
 0x1ec   : > { %4266 = vmatmul.mubr.msk.bf16.gmra.mrb[48].mxu0 %vm682_vm0, %v5161_v23  ;;  %v2837_v23 = vld [vmem:[#allocation2 + $0x68] sm:$0xff] }
 0x1ed   : > { %4269 = vmatprep.mubr.msk.bf16.mxu0 %vm682_vm0, %v5171_v26 }
 0x1ee   : > { %4374 = vmatmul.mubr.msk.bf16.gmra.mrb[20].mxu1 %vm682_vm0, %v5171_v26  ;;  %v2868_v26 = vpack.c.bf16 %v2838_v17, %v2837_v23 }
 0x1ef   : > { %4377 = vmatprep.mubr.msk.bf16.mxu1 %vm682_vm0, %v5173_v28 }
 0x1f4   : > { %4270 = vmatmul.mubr.msk.bf16.gmra.mrb[52].mxu0 %vm682_vm0, %v5173_v28  ;;  %v2839_v28 = vld [vmem:[#allocation2 + $0x88] sm:$0xff] }
 0x1f5   : > { %4273 = vmatprep.mubr.msk.bf16.mxu0 %vm682_vm0, %v5183_v32 }
 0x1f6   : > { %4378 = vmatmul.mubr.msk.bf16.gmra.mrb[24].mxu1 %vm682_vm0, %v5183_v32  ;;  %v2842_v32 = vld [vmem:[#allocation2 + $0xb0] sm:$0xff] }
 0x1f7   : > { %4381 = vmatprep.mubr.msk.bf16.mxu1 %vm682_vm0, %v5185_v36  ;;  %v2870_v49 = vpack.c.bf16 %v2842_v32, %v2841_v47 }
 0x1fc   : > { %4274 = vmatmul.mubr.msk.bf16.gmra.mrb[56].mxu0 %vm682_vm0, %v5185_v36  ;;  %v2844_v36 = vld [vmem:[#allocation2 + $0xd0] sm:$0xff] }
 0x1fd   : > { %v2871_v55 = vpack.c.bf16 %v2844_v36, %v2843_v51 }
 0x1fe   : > { %4382 = vmatmul.mubr.msk.bf16.gmra.mrb[28].mxu1 %vm682_vm0, %v5077_v50  ;;  %v4771_v50 = vld [vmem:[%s5607_s3 + $0x88] sm:$0xff]  }
 0x1ff   : > { %4385 = vmatprep.mubr.msk.bf16.mxu1 %vm682_vm0, %v5079_v53  ;;  %v2869_v53 = vpack.c.bf16 %v2840_v20, %v2839_v28 }
 0x206   : > { %4386 = vmatmul.mubr.msk.bf16.gmra.mrb[0].mxu1 %vm682_vm0, %v2576_v14 }
 0x207   : > { %4393 = vmatprep.mubr.msk.bf16.mxu1 %vm682_vm0, %v2867_v15 }
 0x20e   : > { %4394 = vmatmul.mubr.msk.bf16.vlgmr.msra.gmra.mrb[4].mxu1 %vm682_vm0, %v2868_v26 }
 0x20f   : > { %4426 = vmatpush3.bf16.msra.mxu1 %v4770_v60  ;;  %4397 = vmatprep.mubr.msk.bf16.mxu1 %vm682_vm0, %v2869_v53  ;;  %v2866_v60 = vld [vmem:[#allocation2 + $0x230] sm:$0xff] }
 0x210   : > { %4427 = vmatprep.subr.bf16.mxu1 %v4771_v50  ;;  %v2882_v62 = vpack.c.bf16 %v2866_v60, %v2865_v38 }
 0x213   : > { %4428 = vmatpush3.bf16.msra.mxu1 %v4771_v50 }
 0x216   : > { %4398 = vmatmul.mubr.msk.bf16.gmra.mrb[8].mxu1 %vm682_vm0, %v2870_v49 }
 0x217   : > { %4401 = vmatprep.mubr.msk.bf16.mxu1 %vm682_vm0, %v2871_v55 }
 0x21e   : > { %4402 = vmatmul.mubr.msk.bf16.gmra.mrb[12].mxu1 %vm682_vm0, %v2872_v33 }
 0x21f   : > { %4405 = vmatprep.mubr.msk.bf16.mxu1 %vm682_vm0, %v2873_v1 }
 0x226   : > { %4406 = vmatmul.mubr.msk.bf16.gmra.mrb[16].mxu1 %vm682_vm0, %v2874_v37 }
 0x227   : > { %4409 = vmatprep.mubr.msk.bf16.mxu1 %vm682_vm0, %v2875_v10 }
 0x22e   : > { %4410 = vmatmul.mubr.msk.bf16.gmra.mrb[20].mxu1 %vm682_vm0, %v2876_v19 }
 0x22f   : > { %4413 = vmatprep.mubr.msk.bf16.mxu1 %vm682_vm0, %v2877_v48 }
 0x236   : > { %4414 = vmatmul.mubr.msk.bf16.gmra.mrb[24].mxu1 %vm682_vm0, %v2878_v34 }
 0x237   : > { %4417 = vmatprep.mubr.msk.bf16.mxu1 %vm682_vm0, %v2879_v35 }
 0x23e   : > { %4418 = vmatmul.mubr.msk.bf16.gmra.mrb[28].mxu1 %vm682_vm0, %v2880_v44 }
 0x23f   : > { %4421 = vmatprep.mubr.msk.bf16.mxu1 %vm682_vm0, %v5195_v45  ;;  %v3171_v45 = vld [vmem:[#allocation2 + $0x229] sm:$0xff] }
 0x246   : > { %4422 = vmatmul.mubr.msk.bf16.gmra.mrb[0].mxu1 %vm682_vm0, %v2882_v62 }
 0x247   : > { %4429 = vmatprep.mubr.msk.bf16.mxu1 %vm682_vm0, %v5203_v54  ;;  %v3172_v54 = vld [vmem:[#allocation2 + $0x231] sm:$0xff] }
 0x24e   : > { %4430 = vmatmul.mubr.msk.bf16.vlgmr.msra.gmra.mrb[4].mxu1 %vm682_vm0, %v5209_v56  ;;  %v3188_v56 = vpack.c.bf16 %v3172_v54, %v3171_v45 }
 0x24f   : > { %4433 = vmatprep.mubr.msk.bf16.mxu1 %vm682_vm0, %v5225_v0 }
 0x256   : > { %4434 = vmatmul.mubr.msk.bf16.gmra.mrb[8].mxu1 %vm682_vm0, %v5231_v30 }
 0x257   : > { %4437 = vmatprep.mubr.msk.bf16.mxu1 %vm682_vm0, %v5239_v5 }
 0x25e   : > { %4438 = vmatmul.mubr.msk.bf16.gmra.mrb[12].mxu1 %vm682_vm0, %v5243_v22 }
 0x25f   : > { %4441 = vmatprep.mubr.msk.bf16.mxu1 %vm682_vm0, %v5251_v59 }
 0x266   : > { %4442 = vmatmul.mubr.msk.bf16.gmra.mrb[16].mxu1 %vm682_vm0, %v5255_v12 }
 0x267   : > { %4445 = vmatprep.mubr.msk.bf16.mxu1 %vm682_vm0, %v5263_v21 }
 0x26e   : > { %4446 = vmatmul.mubr.msk.bf16.gmra.mrb[20].mxu1 %vm682_vm0, %v5267_v24 }
 0x26f   : > { %4449 = vmatprep.mubr.msk.bf16.mxu1 %vm682_vm0, %v5275_v8 }
 0x276   : > { %4450 = vmatmul.mubr.msk.bf16.gmra.mrb[24].mxu1 %vm682_vm0, %v5279_v29 }
 0x277   : > { %4453 = vmatprep.mubr.msk.bf16.mxu1 %vm682_vm0, %v5287_v40 }
 0x27e   : > { %4454 = vmatmul.mubr.msk.bf16.gmra.mrb[28].mxu1 %vm682_vm0, %v5291_v42 }
 0x27f   : > { %4457 = vmatprep.mubr.msk.bf16.mxu1 %vm682_vm0, %v5299_v46 }
 0x286   : > { %4458 = vmatmul.mubr.msk.bf16.gmra.mrb[0].mxu1 %vm682_vm0, %v3188_v56 }
 0x297   : > { %v5422_v0 = vpop.f32.mrb[60].mxu0 }
 0x298   : > { %v5424_v30 = vpop.f32.mrb[61].mxu0 }
 0x299   : > { %v5426_v5 = vpop.f32.mrb[62].mxu0 }
 0x29a   : > { %v5428_v22 = vpop.f32.mrb[63].mxu0 }
 0x29f   : > { %v4251_v59 = vpop.f32.mrb[32].mxu0 }
 0x2a0   : > { %v1757_v12 = vpop.f32.mrb[33].mxu0 }
 0x2a1   : > { %v4252_v21 = vpop.f32.mrb[34].mxu0 }
 0x2a2   : > { %v1760_v24 = vpop.f32.mrb[35].mxu0 }
 0x2a7   : > { %v4255_v8 = vpop.f32.mrb[36].mxu0 }
 0x2a8   : > { %v1773_v29 = vpop.f32.mrb[37].mxu0 }
 0x2a9   : > { %v4256_v40 = vpop.f32.mrb[38].mxu0 }
 0x2aa   : > { %v1776_v42 = vpop.f32.mrb[39].mxu0 }
 0x2af   : > { %v5430_v46 = vpop.f32.mrb[40].mxu0 }
 0x2b0   : > { %v5432_v4 = vpop.f32.mrb[41].mxu0 }
 0x2b1   : > { %v5434_v14 = vpop.f32.mrb[42].mxu0 }
 0x2b2   : > { %v5436_v7 = vpop.f32.mrb[43].mxu0 }
 0x2b7   : > { %v5438_v11 = vpop.f32.mrb[44].mxu0 }
 0x2b8   : > { %v5440_v15 = vpop.f32.mrb[45].mxu0 }
 0x2b9   : > { %v5442_v17 = vpop.f32.mrb[46].mxu0 }
 0x2ba   : > { %v5444_v20 = vpop.f32.mrb[47].mxu0 }
 0x2bf   : > { %v5446_v23 = vpop.f32.mrb[48].mxu0 }
 0x2c0   : > { %v5448_v26 = vpop.f32.mrb[49].mxu0 }
 0x2c1   : > { %v5450_v28 = vpop.f32.mrb[50].mxu0 }
 0x2c2   : > { %v5452_v50 = vpop.f32.mrb[51].mxu0 }
 0x2c7   : > { %v5454_v53 = vpop.f32.mrb[52].mxu0 }
 0x2c8   : > { %v5456_v32 = vpop.f32.mrb[53].mxu0 }
 0x2c9   : > { %v5458_v36 = vpop.f32.mrb[54].mxu0 }
 0x2ca   : > { %v5460_v47 = vpop.f32.mrb[55].mxu0 }
 0x2cf   : > { %v5462_v49 = vpop.f32.mrb[56].mxu0 }
 0x2d0   : > { %v5464_v51 = vpop.f32.mrb[57].mxu0 }
 0x2d1   : > { %v5466_v55 = vpop.f32.mrb[58].mxu0 }
 0x2d2   : > { %v5468_v57 = vpop.f32.mrb[59].mxu0 }
 0x321   : > { %v4431_v58 = vpop.f32.mrb[4].mxu1 }
 0x322   : > { %v4465_v33 = vadd.f32 %v4431_v58, %v4251_v59  ;;  %v3288_v9 = vpop.f32.mrb[5].mxu1 }
 0x323   : > { %v4466_v1 = vadd.f32 %v3288_v9, %v1757_v12  ;;  %v4432_v2 = vpop.f32.mrb[6].mxu1 }
 0x324   : > { %v3456_v3 = vadd.f32 %v4465_v33, %v5473_v61  ;;  %v4467_v31 = vadd.f32 %v4432_v2, %v4252_v21  ;;  %v3291_v37 = vpop.f32.mrb[7].mxu1 }
 0x325   : > { %v3454_v6 = vadd.f32 %v4466_v1, %v5473_v61  ;;  %v4468_v10 = vadd.f32 %v3291_v37, %v1760_v24 }
 0x326   : > { %vm3488_vm0 = vcmp.ge.f32.partialorder %v3456_v3, 0.0  ;;  %v3520_v41 = vmul.f32 0.2, %v3456_v3  ;;  %v3457_v16 = vadd.f32 %v4467_v31, %v5473_v61 }
 0x327   : > { %vm3486_vm4 = vcmp.ge.f32.partialorder %v3454_v6, 0.0  ;;  %v3518_v63 = vmul.f32 0.2, %v3454_v6  ;;  %v3455_v19 = vadd.f32 %v4468_v10, %v5473_v61 }
 0x328   : > { %v3552_v18 = vsel %vm3488_vm0, %v3456_v3, %v3520_v41  ;;  %vm3489_vm5 = vcmp.ge.f32.partialorder %v3457_v16, 0.0  ;;  %v3521_v48 = vmul.f32 0.2, %v3457_v16 }
 0x329   : > { %3585 = vst.msk [vmem:[%s5481_s12 + $0x10] sm:$0xff] %vm3582_vm3, %v3552_v18  ;;  %v3550_v25 = vsel %vm3486_vm4, %v3454_v6, %v3518_v63  ;;  %vm3487_vm6 = vcmp.ge.f32.partialorder %v3455_v19, 0.0  ;;  %v3519_v27 = vmul.f32 0.2, %v3455_v19  ;;  %v4435_v52 = vpop.f32.mrb[8].mxu1 }
 0x32a   : > { %3583 = vst.msk [vmem:[%s5481_s12] sm:$0xff] %vm3582_vm3, %v3550_v25  ;;  %v3553_v34 = vsel %vm3489_vm5, %v3457_v16, %v3521_v48  ;;  %v4469_v13 = vadd.f32 %v4435_v52, %v4255_v8  ;;  %v3304_v35 = vpop.f32.mrb[9].mxu1 }
 0x32b   : > { %3586 = vst.msk [vmem:[%s5481_s12 + $0x18] sm:$0xff] %vm3582_vm3, %v3553_v34  ;;  %v3551_v39 = vsel %vm3487_vm6, %v3455_v19, %v3519_v27  ;;  %v4470_v43 = vadd.f32 %v3304_v35, %v1773_v29  ;;  %v4436_v44 = vpop.f32.mrb[10].mxu1 }
 0x32c   : > { %3584 = vst.msk [vmem:[%s5481_s12 + $0x8] sm:$0xff] %vm3582_vm3, %v3551_v39  ;;  %v3460_v38 = vadd.f32 %v4469_v13, %v5473_v61  ;;  %v4471_v60 = vadd.f32 %v4436_v44, %v4256_v40  ;;  %v3307_v62 = vpop.f32.mrb[11].mxu1 }
 0x32d   : > { %v3458_v45 = vadd.f32 %v4470_v43, %v5473_v61  ;;  %v4472_v54 = vadd.f32 %v3307_v62, %v1776_v42 }
 0x32e   : > { %vm3492_vm7 = vcmp.ge.f32.partialorder %v3460_v38, 0.0  ;;  %v3524_v56 = vmul.f32 0.2, %v3460_v38  ;;  %v3461_v59 = vadd.f32 %v4471_v60, %v5473_v61 }
 0x32f   : > { %vm3490_vm8 = vcmp.ge.f32.partialorder %v3458_v45, 0.0  ;;  %v3522_v12 = vmul.f32 0.2, %v3458_v45  ;;  %v3459_v21 = vadd.f32 %v4472_v54, %v5473_v61 }
 0x330   : > { %v3556_v24 = vsel %vm3492_vm7, %v3460_v38, %v3524_v56  ;;  %vm3493_vm9 = vcmp.ge.f32.partialorder %v3461_v59, 0.0  ;;  %v3525_v8 = vmul.f32 0.2, %v3461_v59 }
 0x331   : > { %3589 = vst.msk [vmem:[%s5481_s12 + $0x30] sm:$0xff] %vm3582_vm3, %v3556_v24  ;;  %v3554_v29 = vsel %vm3490_vm8, %v3458_v45, %v3522_v12  ;;  %vm3491_vm10 = vcmp.ge.f32.partialorder %v3459_v21, 0.0  ;;  %v3523_v40 = vmul.f32 0.2, %v3459_v21  ;;  %v4439_v58 = vpop.f32.mrb[12].mxu1 }
 0x332   : > { %3587 = vst.msk [vmem:[%s5481_s12 + $0x20] sm:$0xff] %vm3582_vm3, %v3554_v29  ;;  %v3557_v42 = vsel %vm3493_vm9, %v3461_v59, %v3525_v8  ;;  %v4473_v33 = vadd.f32 %v4439_v58, %v5430_v46  ;;  %v3320_v9 = vpop.f32.mrb[13].mxu1 }
 0x333   : > { %3590 = vst.msk [vmem:[%s5481_s12 + $0x38] sm:$0xff] %vm3582_vm3, %v3557_v42  ;;  %v3555_v1 = vsel %vm3491_vm10, %v3459_v21, %v3523_v40  ;;  %v4474_v2 = vadd.f32 %v3320_v9, %v5432_v4  ;;  %v4440_v3 = vpop.f32.mrb[14].mxu1 }
 0x334   : > { %3588 = vst.msk [vmem:[%s5481_s12 + $0x28] sm:$0xff] %vm3582_vm3, %v3555_v1  ;;  %v3464_v31 = vadd.f32 %v4473_v33, %v5473_v61  ;;  %v4475_v37 = vadd.f32 %v4440_v3, %v5434_v14  ;;  %v3323_v6 = vpop.f32.mrb[15].mxu1 }
 0x335   : > { %v3462_v10 = vadd.f32 %v4474_v2, %v5473_v61  ;;  %v4476_v46 = vadd.f32 %v3323_v6, %v5436_v7 }
 0x336   : > { %vm3496_vm11 = vcmp.ge.f32.partialorder %v3464_v31, 0.0  ;;  %v3528_v41 = vmul.f32 0.2, %v3464_v31  ;;  %v3465_v16 = vadd.f32 %v4475_v37, %v5473_v61 }
 0x337   : > { %vm3494_vm12 = vcmp.ge.f32.partialorder %v3462_v10, 0.0  ;;  %v3526_v4 = vmul.f32 0.2, %v3462_v10  ;;  %v3463_v63 = vadd.f32 %v4476_v46, %v5473_v61 }
 0x338   : > { %v3560_v19 = vsel %vm3496_vm11, %v3464_v31, %v3528_v41  ;;  %vm3497_vm13 = vcmp.ge.f32.partialorder %v3465_v16, 0.0  ;;  %v3529_v18 = vmul.f32 0.2, %v3465_v16 }
 0x339   : > { %3593 = vst.msk [vmem:[%s5481_s12 + $0x50] sm:$0xff] %vm3582_vm3, %v3560_v19  ;;  %v3558_v14 = vsel %vm3494_vm12, %v3462_v10, %v3526_v4  ;;  %vm3495_vm14 = vcmp.ge.f32.partialorder %v3463_v63, 0.0  ;;  %v3527_v48 = vmul.f32 0.2, %v3463_v63  ;;  %v4443_v25 = vpop.f32.mrb[16].mxu1 }
 0x33a   : > { %3591 = vst.msk [vmem:[%s5481_s12 + $0x40] sm:$0xff] %vm3582_vm3, %v3558_v14  ;;  %v3561_v7 = vsel %vm3497_vm13, %v3465_v16, %v3529_v18  ;;  %v4477_v27 = vadd.f32 %v4443_v25, %v5438_v11  ;;  %v3336_v52 = vpop.f32.mrb[17].mxu1 }
 0x33b   : > { %3594 = vst.msk [vmem:[%s5481_s12 + $0x58] sm:$0xff] %vm3582_vm3, %v3561_v7  ;;  %v3559_v34 = vsel %vm3495_vm14, %v3463_v63, %v3527_v48  ;;  %v4478_v13 = vadd.f32 %v3336_v52, %v5440_v15  ;;  %v4444_v35 = vpop.f32.mrb[18].mxu1 }
 0x33c   : > { %3592 = vst.msk [vmem:[%s5481_s12 + $0x48] sm:$0xff] %vm3582_vm3, %v3559_v34  ;;  %v3468_v39 = vadd.f32 %v4477_v27, %v5473_v61  ;;  %v4479_v43 = vadd.f32 %v4444_v35, %v5442_v17  ;;  %v3339_v44 = vpop.f32.mrb[19].mxu1 }
 0x33d   : > { %v3466_v38 = vadd.f32 %v4478_v13, %v5473_v61  ;;  %v4480_v11 = vadd.f32 %v3339_v44, %v5444_v20 }
 0x33e   : > { %vm3500_vm15 = vcmp.ge.f32.partialorder %v3468_v39, 0.0  ;;  %v3532_v60 = vmul.f32 0.2, %v3468_v39  ;;  %v3469_v62 = vadd.f32 %v4479_v43, %v5473_v61 }
 0x33f   : > { %vm3498_vm1 = vcmp.ge.f32.partialorder %v3466_v38, 0.0  ;;  %v3530_v15 = vmul.f32 0.2, %v3466_v38  ;;  %v3467_v45 = vadd.f32 %v4480_v11, %v5473_v61 }
 0x340   : > { %v3564_v54 = vsel %vm3500_vm15, %v3468_v39, %v3532_v60  ;;  %vm3501_vm2 = vcmp.ge.f32.partialorder %v3469_v62, 0.0  ;;  %v3533_v56 = vmul.f32 0.2, %v3469_v62 }
 0x341   : > { %3597 = vst.msk [vmem:[%s5481_s12 + $0x70] sm:$0xff] %vm3582_vm3, %v3564_v54  ;;  %v3562_v17 = vsel %vm3498_vm1, %v3466_v38, %v3530_v15  ;;  %vm3499_vm0 = vcmp.ge.f32.partialorder %v3467_v45, 0.0  ;;  %v3531_v59 = vmul.f32 0.2, %v3467_v45  ;;  %v4447_v12 = vpop.f32.mrb[20].mxu1 }
 0x342   : > { %3595 = vst.msk [vmem:[%s5481_s12 + $0x60] sm:$0xff] %vm3582_vm3, %v3562_v17  ;;  %v3565_v20 = vsel %vm3501_vm2, %v3469_v62, %v3533_v56  ;;  %v4481_v21 = vadd.f32 %v4447_v12, %v5446_v23  ;;  %v3352_v24 = vpop.f32.mrb[21].mxu1 }
 0x343   : > { %3598 = vst.msk [vmem:[%s5481_s12 + $0x78] sm:$0xff] %vm3582_vm3, %v3565_v20  ;;  %v3563_v8 = vsel %vm3499_vm0, %v3467_v45, %v3531_v59  ;;  %v4482_v29 = vadd.f32 %v3352_v24, %v5448_v26  ;;  %v4448_v40 = vpop.f32.mrb[22].mxu1 }
 0x344   : > { %3596 = vst.msk [vmem:[%s5481_s12 + $0x68] sm:$0xff] %vm3582_vm3, %v3563_v8  ;;  %v3472_v58 = vadd.f32 %v4481_v21, %v5473_v61  ;;  %v4483_v42 = vadd.f32 %v4448_v40, %v5450_v28  ;;  %v3355_v33 = vpop.f32.mrb[23].mxu1 }
 0x345   : > { %v3470_v9 = vadd.f32 %v4482_v29, %v5473_v61  ;;  %v4484_v23 = vadd.f32 %v3355_v33, %v5452_v50 }
 0x346   : > { %vm3504_vm4 = vcmp.ge.f32.partialorder %v3472_v58, 0.0  ;;  %v3536_v1 = vmul.f32 0.2, %v3472_v58  ;;  %v3473_v2 = vadd.f32 %v4483_v42, %v5473_v61 }
 0x347   : > { %vm3502_vm5 = vcmp.ge.f32.partialorder %v3470_v9, 0.0  ;;  %v3534_v26 = vmul.f32 0.2, %v3470_v9  ;;  %v3471_v3 = vadd.f32 %v4484_v23, %v5473_v61 }
 0x348   : > { %v3568_v31 = vsel %vm3504_vm4, %v3472_v58, %v3536_v1  ;;  %vm3505_vm6 = vcmp.ge.f32.partialorder %v3473_v2, 0.0  ;;  %v3537_v37 = vmul.f32 0.2, %v3473_v2 }
 0x349   : > { %3601 = vst.msk [vmem:[%s5481_s12 + $0x90] sm:$0xff] %vm3582_vm3, %v3568_v31  ;;  %v3566_v28 = vsel %vm3502_vm5, %v3470_v9, %v3534_v26  ;;  %vm3503_vm7 = vcmp.ge.f32.partialorder %v3471_v3, 0.0  ;;  %v3535_v6 = vmul.f32 0.2, %v3471_v3  ;;  %v4451_v10 = vpop.f32.mrb[24].mxu1 }
 0x34a   : > { %3599 = vst.msk [vmem:[%s5481_s12 + $0x80] sm:$0xff] %vm3582_vm3, %v3566_v28  ;;  %v3569_v50 = vsel %vm3505_vm6, %v3473_v2, %v3537_v37  ;;  %v4485_v46 = vadd.f32 %v4451_v10, %v5454_v53  ;;  %v3368_v41 = vpop.f32.mrb[25].mxu1 }
 0x34b   : > { %3602 = vst.msk [vmem:[%s5481_s12 + $0x98] sm:$0xff] %vm3582_vm3, %v3569_v50  ;;  %v3567_v16 = vsel %vm3503_vm7, %v3471_v3, %v3535_v6  ;;  %v4486_v4 = vadd.f32 %v3368_v41, %v5456_v32  ;;  %v4452_v63 = vpop.f32.mrb[26].mxu1 }
 0x34c   : > { %3600 = vst.msk [vmem:[%s5481_s12 + $0x88] sm:$0xff] %vm3582_vm3, %v3567_v16  ;;  %v3476_v19 = vadd.f32 %v4485_v46, %v5473_v61  ;;  %v4487_v18 = vadd.f32 %v4452_v63, %v5458_v36  ;;  %v3371_v14 = vpop.f32.mrb[27].mxu1 }
 0x34d   : > { %v3474_v48 = vadd.f32 %v4486_v4, %v5473_v61  ;;  %v4488_v53 = vadd.f32 %v3371_v14, %v5460_v47 }
 0x34e   : > { %vm3508_vm8 = vcmp.ge.f32.partialorder %v3476_v19, 0.0  ;;  %v3540_v25 = vmul.f32 0.2, %v3476_v19  ;;  %v3477_v7 = vadd.f32 %v4487_v18, %v5473_v61 }
 0x34f   : > { %vm3506_vm9 = vcmp.ge.f32.partialorder %v3474_v48, 0.0  ;;  %v3538_v32 = vmul.f32 0.2, %v3474_v48  ;;  %v3475_v27 = vadd.f32 %v4488_v53, %v5473_v61 }
 0x350   : > { %v3572_v52 = vsel %vm3508_vm8, %v3476_v19, %v3540_v25  ;;  %vm3509_vm10 = vcmp.ge.f32.partialorder %v3477_v7, 0.0  ;;  %v3541_v34 = vmul.f32 0.2, %v3477_v7 }
 0x351   : > { %3605 = vst.msk [vmem:[%s5481_s12 + $0xb0] sm:$0xff] %vm3582_vm3, %v3572_v52  ;;  %v3570_v36 = vsel %vm3506_vm9, %v3474_v48, %v3538_v32  ;;  %vm3507_vm11 = vcmp.ge.f32.partialorder %v3475_v27, 0.0  ;;  %v3539_v13 = vmul.f32 0.2, %v3475_v27  ;;  %v4455_v35 = vpop.f32.mrb[28].mxu1 }
 0x352   : > { %3603 = vst.msk [vmem:[%s5481_s12 + $0xa0] sm:$0xff] %vm3582_vm3, %v3570_v36  ;;  %v3573_v47 = vsel %vm3509_vm10, %v3477_v7, %v3541_v34  ;;  %v4489_v39 = vadd.f32 %v4455_v35, %v5462_v49  ;;  %v3384_v43 = vpop.f32.mrb[29].mxu1 }
 0x353   : > { %3606 = vst.msk [vmem:[%s5481_s12 + $0xb8] sm:$0xff] %vm3582_vm3, %v3573_v47  ;;  %v3571_v44 = vsel %vm3507_vm11, %v3475_v27, %v3539_v13  ;;  %v4490_v38 = vadd.f32 %v3384_v43, %v5464_v51  ;;  %v4456_v11 = vpop.f32.mrb[30].mxu1 }
 0x354   : > { %3604 = vst.msk [vmem:[%s5481_s12 + $0xa8] sm:$0xff] %vm3582_vm3, %v3571_v44  ;;  %v3480_v60 = vadd.f32 %v4489_v39, %v5473_v61  ;;  %v4491_v62 = vadd.f32 %v4456_v11, %v5466_v55  ;;  %v3387_v15 = vpop.f32.mrb[31].mxu1 }
 0x355   : > { %v3478_v45 = vadd.f32 %v4490_v38, %v5473_v61  ;;  %v4492_v49 = vadd.f32 %v3387_v15, %v5468_v57 }
 0x356   : > { %vm3512_vm12 = vcmp.ge.f32.partialorder %v3480_v60, 0.0  ;;  %v3544_v54 = vmul.f32 0.2, %v3480_v60  ;;  %v3481_v56 = vadd.f32 %v4491_v62, %v5473_v61 }
 0x357   : > { %vm3510_vm13 = vcmp.ge.f32.partialorder %v3478_v45, 0.0  ;;  %v3542_v51 = vmul.f32 0.2, %v3478_v45  ;;  %v3479_v17 = vadd.f32 %v4492_v49, %v5473_v61 }
 0x358   : > { %v3576_v59 = vsel %vm3512_vm12, %v3480_v60, %v3544_v54  ;;  %vm3513_vm14 = vcmp.ge.f32.partialorder %v3481_v56, 0.0  ;;  %v3545_v12 = vmul.f32 0.2, %v3481_v56 }
 0x359   : > { %3609 = vst.msk [vmem:[%s5481_s12 + $0xd0] sm:$0xff] %vm3582_vm3, %v3576_v59  ;;  %v3574_v55 = vsel %vm3510_vm13, %v3478_v45, %v3542_v51  ;;  %vm3511_vm15 = vcmp.ge.f32.partialorder %v3479_v17, 0.0  ;;  %v3543_v20 = vmul.f32 0.2, %v3479_v17  ;;  %v4459_v21 = vpop.f32.mrb[0].mxu1 }
 0x35a   : > { %3607 = vst.msk [vmem:[%s5481_s12 + $0xc0] sm:$0xff] %vm3582_vm3, %v3574_v55  ;;  %v3577_v57 = vsel %vm3513_vm14, %v3481_v56, %v3545_v12  ;;  %v4493_v24 = vadd.f32 %v4459_v21, %v5422_v0  ;;  %v3400_v8 = vpop.f32.mrb[1].mxu1 }
 0x35b   : > { %3610 = vst.msk [vmem:[%s5481_s12 + $0xd8] sm:$0xff] %vm3582_vm3, %v3577_v57  ;;  %v3575_v29 = vsel %vm3511_vm15, %v3479_v17, %v3543_v20  ;;  %v4494_v40 = vadd.f32 %v3400_v8, %v5424_v30  ;;  %v4460_v58 = vpop.f32.mrb[2].mxu1 }
 0x35c   : > { %3608 = vst.msk [vmem:[%s5481_s12 + $0xc8] sm:$0xff] %vm3582_vm3, %v3575_v29  ;;  %v3484_v42 = vadd.f32 %v4493_v24, %v5473_v61  ;;  %v4495_v33 = vadd.f32 %v4460_v58, %v5426_v5  ;;  %v3403_v9 = vpop.f32.mrb[3].mxu1 }
 0x35d   : > { %v3482_v23 = vadd.f32 %v4494_v40, %v5473_v61  ;;  %v4496_v0 = vadd.f32 %v3403_v9, %v5428_v22 }
 0x35e   : > { %vm3516_vm1 = vcmp.ge.f32.partialorder %v3484_v42, 0.0  ;;  %v3548_v1 = vmul.f32 0.2, %v3484_v42  ;;  %v3485_v30 = vadd.f32 %v4495_v33, %v5473_v61 }
 0x35f   : > { %vm3514_vm2 = vcmp.ge.f32.partialorder %v3482_v23, 0.0  ;;  %v3546_v2 = vmul.f32 0.2, %v3482_v23  ;;  %v3483_v26 = vadd.f32 %v4496_v0, %v5473_v61 }
 0x360   : > { %v3580_v3 = vsel %vm3516_vm1, %v3484_v42, %v3548_v1  ;;  %vm3517_vm0 = vcmp.ge.f32.partialorder %v3485_v30, 0.0  ;;  %v3549_v31 = vmul.f32 0.2, %v3485_v30 }
 0x361   : > { %3613 = vst.msk [vmem:[%s5481_s12 + $0xf0] sm:$0xff] %vm3582_vm3, %v3580_v3  ;;  %v3578_v5 = vsel %vm3514_vm2, %v3482_v23, %v3546_v2  ;;  %vm3515_vm4 = vcmp.ge.f32.partialorder %v3483_v26, 0.0  ;;  %v3547_v37 = vmul.f32 0.2, %v3483_v26 }
 0x362   : > { %3611 = vst.msk [vmem:[%s5481_s12 + $0xe0] sm:$0xff] %vm3582_vm3, %v3578_v5  ;;  %v3581_v22 = vsel %vm3517_vm0, %v3485_v30, %v3549_v31 }
 0x363   : > { %3614 = vst.msk [vmem:[%s5481_s12 + $0xf8] sm:$0xff] %vm3582_vm3, %v3581_v22  ;;  %v3579_v28 = vsel %vm3515_vm4, %v3483_v26, %v3547_v37 }
 0x364   : > { %3612 = vst.msk [vmem:[%s5481_s12 + $0xe8] sm:$0xff] %vm3582_vm3, %v3579_v28 }
 0x365 PF: > { %s15_s18 = sadd.s32 1, %s4778_s18  }
 0x366   : > { %p12_p4 = scmp.ge.s32.totalorder %s15_s18, 4  }
 0x368   :  { %14 = sbr.rel (!%p12_p4) target bundleno = 1 (0x1), region = 81 }

</bundles_post_ra>
